<compile_context>
chip_gen: v7x
topology: tpu7x:2x2x1
jax: 0.10.0
libtpu: 0.0.40
codegen_flags: <defaults>
</compile_context>

<pallas_src>
import math
from functools import partial

import jax
import jax.numpy as jnp
import numpy as np
from jax.experimental import pallas as pl
from jax.experimental.pallas import tpu as pltpu


# ----------------------------------------------------------------------------
# Fused Pallas kernel: both cross-attention stages for an (nb, L, E) block
# ----------------------------------------------------------------------------
def _cross_attention_kernel(q_ref, k_ref, v_ref,
                            w_ref,    # (4, E, E)  [Wq*scale, Wk, Wv, Wo], x@W layout
                            vec_ref,  # (8, E)     [bq*scale, bk, bv, bo, g1, b1, g2, b2]
                            qo_ref, ko_ref,
                            pv_ref,   # (nb, L, E) VMEM scratch for per-head PV slabs
                            *, n_heads):
    nb, L, E = q_ref.shape
    D = E // n_heads

    wq, wk, wv, wo = w_ref[0], w_ref[1], w_ref[2], w_ref[3]
    bq = vec_ref[0:1, :]
    bk = vec_ref[1:2, :]
    bv = vec_ref[2:3, :]
    bo = vec_ref[3:4, :]
    g1, be1 = vec_ref[4:5, :], vec_ref[5:6, :]
    g2, be2 = vec_ref[6:7, :], vec_ref[7:8, :]

    # Fold batch into sublanes for all dense (projection / out-proj / LN) math.
    xq = q_ref[...].reshape(nb * L, E)
    xk = k_ref[...].reshape(nb * L, E)
    xv = v_ref[...].reshape(nb * L, E)

    # Full-width projections.  V is shared by both stages; stage-2's query
    # projection depends only on xk so it is issued up front (overlaps with
    # stage-1 softmax on the EUP/VPU).
    q1 = jnp.dot(xq, wq, preferred_element_type=jnp.float32) + bq   # stage-1 Q (scale folded)
    k1 = jnp.dot(xk, wk, preferred_element_type=jnp.float32) + bk   # stage-1 K
    vp = jnp.dot(xv, wv, preferred_element_type=jnp.float32) + bv   # shared  V
    q2 = jnp.dot(xk, wq, preferred_element_type=jnp.float32) + bq   # stage-2 Q

    vp_b = vp.reshape(nb, L, E)

    def attention(qp, kp):
        """Per-head attention: heads are static lane slices of (nb,L,E) slabs;
        each head's PV lands in the VMEM scratch at its static lane offset so
        the out-projection afterwards is a single full-width matmul."""
        qp_b = qp.reshape(nb, L, E)
        kp_b = kp.reshape(nb, L, E)
        for h in range(n_heads):
            lo, hi = h * D, (h + 1) * D
            qh = qp_b[:, :, lo:hi]                                    # (nb, L, D)
            kh = kp_b[:, :, lo:hi]
            vh = vp_b[:, :, lo:hi]
            s = jnp.einsum('bqd,bkd->bqk', qh, kh,
                           preferred_element_type=jnp.float32)        # (nb, L, L)
            m = jnp.max(s, axis=-1, keepdims=True)
            p = jnp.exp(s - m)
            r = pl.reciprocal(jnp.sum(p, axis=-1, keepdims=True), approx=False)
            p = p * r                                                 # exact recip + mul
            pv_ref[:, :, lo:hi] = jnp.einsum('bqk,bkd->bqd', p, vh,
                                             preferred_element_type=jnp.float32)
        return pv_ref[...].reshape(nb * L, E)

    def out_proj_residual_ln(x, pv_full, gamma, beta):
        attn = jnp.dot(pv_full, wo, preferred_element_type=jnp.float32) + bo
        y = x + attn
        mu = jnp.mean(y, axis=-1, keepdims=True)
        var = jnp.mean((y - mu) * (y - mu), axis=-1, keepdims=True)
        return (y - mu) * jax.lax.rsqrt(var + 1e-5) * gamma + beta    # eps matches PyTorch

    # Stage 1: q' = LN1(q + MHA(q, k, v))
    q_new = out_proj_residual_ln(xq, attention(q1, k1), g1, be1)

    # Stage 2: k' = LN2(k + MHA(k, q', v)).  Only the key projection sits on the
    # serial path behind q_new.
    k2 = jnp.dot(q_new, wk, preferred_element_type=jnp.float32) + bk
    k_new = out_proj_residual_ln(xk, attention(q2, k2), g2, be2)

    qo_ref[...] = q_new.reshape(nb, L, E)
    ko_ref[...] = k_new.reshape(nb, L, E)


# ----------------------------------------------------------------------------
# Wrapper
# ----------------------------------------------------------------------------
def cross_attention(q, k, v, w, vec, n_heads, batch_per_block=None):
    """Fused Pallas implementation of CrossAttention.forward -> (q', k')."""
    B, L, E = q.shape

    if batch_per_block is None:
        # v7x has 2 TensorCores/chip -> one batch element per grid step so the
        # "parallel" grid axis splits the batch across cores.  v5e/v6e are single-TC,
        # so fold the whole batch into one block (no grid-step overhead, doubled
        # sublane occupancy of every dense op).
        try:
            kind = jax.devices()[0].device_kind.lower()
        except Exception:
            kind = ""
        batch_per_block = 1 if "7" in kind else B
    nb = max(1, min(B, batch_per_block))
    while B % nb != 0:
        nb -= 1
    grid = (B // nb,)

    kernel = partial(_cross_attention_kernel, n_heads=n_heads)
    q_new, k_new = pl.pallas_call(
        kernel,
        out_shape=(jax.ShapeDtypeStruct((B, L, E), jnp.float32),
                   jax.ShapeDtypeStruct((B, L, E), jnp.float32)),
        grid_spec=pltpu.PrefetchScalarGridSpec(
            num_scalar_prefetch=0,
            grid=grid,
            in_specs=[
                pl.BlockSpec((nb, L, E), lambda b: (b, 0, 0)),   # q
                pl.BlockSpec((nb, L, E), lambda b: (b, 0, 0)),   # k
                pl.BlockSpec((nb, L, E), lambda b: (b, 0, 0)),   # v
                pl.BlockSpec(w.shape, lambda b: (0, 0, 0)),      # packed weights (4,E,E)
                pl.BlockSpec(vec.shape, lambda b: (0, 0)),       # packed biases/LN (8,E)
            ],
            out_specs=[
                pl.BlockSpec((nb, L, E), lambda b: (b, 0, 0)),   # q'
                pl.BlockSpec((nb, L, E), lambda b: (b, 0, 0)),   # k'
            ],
            scratch_shapes=[pltpu.VMEM((nb, L, E), jnp.float32)],
        ),
        compiler_params=pltpu.CompilerParams(
            dimension_semantics=("parallel",)),
    )(q, k, v, w, vec)
    return q_new, k_new


def prepare_params(in_proj_weight, in_proj_bias, out_proj_weight, out_proj_bias,
                   ln1_gamma, ln1_beta, ln2_gamma, ln2_beta, n_heads):
    """Host-side repack of PyTorch-layout MHA params into two dense slabs.

    Weights are stored in x@W layout with heads concatenated along the output
    (lane) axis; 1/sqrt(D) is folded into Wq/bq.
    """
    E = out_proj_weight.shape[0]
    D = E // n_heads
    scale = 1.0 / math.sqrt(D)

    wq = in_proj_weight[0 * E:1 * E].T * scale
    wk = in_proj_weight[1 * E:2 * E].T
    wv = in_proj_weight[2 * E:3 * E].T
    wo = out_proj_weight.T
    w = jnp.stack([wq, wk, wv, wo])                               # (4, E, E)

    bq = in_proj_bias[0 * E:1 * E] * scale
    bk = in_proj_bias[1 * E:2 * E]
    bv = in_proj_bias[2 * E:3 * E]
    vec = jnp.stack([bq, bk, bv, out_proj_bias,
                     ln1_gamma, ln1_beta, ln2_gamma, ln2_beta])   # (8, E)
    return w, vec


# ----------------------------------------------------------------------------
# Pure-JAX reference (mirrors torch.nn.MultiheadAttention + LayerNorm math)
# ----------------------------------------------------------------------------
def _ref_mha_ln(query, key, value, in_w, in_b, out_w, out_b, gamma, beta, n_heads):
    B, Lq, E = query.shape
    D = E // n_heads
    wq, wk, wv = in_w[0:E], in_w[E:2 * E], in_w[2 * E:3 * E]
    bq, bk, bv = in_b[0:E], in_b[E:2 * E], in_b[2 * E:3 * E]
    qp = (query @ wq.T + bq).reshape(B, Lq, n_heads, D)
    kp = (key @ wk.T + bk).reshape(B, -1, n_heads, D)
    vp = (value @ wv.T + bv).reshape(B, -1, n_heads, D)
    s = jnp.einsum('bqhd,bkhd->bhqk', qp, kp) / math.sqrt(D)
    p = jax.nn.softmax(s, axis=-1)
    o = jnp.einsum('bhqk,bkhd->bqhd', p, vp).reshape(B, Lq, E)
    attn = o @ out_w.T + out_b
    x = query + attn
    mu = jnp.mean(x, axis=-1, keepdims=True)
    var = jnp.mean((x - mu) ** 2, axis=-1, keepdims=True)
    return (x - mu) / jnp.sqrt(var + 1e-5) * gamma + beta


def _ref_cross_attention(q, k, v, in_w, in_b, out_w, out_b, ln1, ln2, n_heads):
    q_new = _ref_mha_ln(q, k, v, in_w, in_b, out_w, out_b, ln1[0], ln1[1], n_heads)
    k_new = _ref_mha_ln(k, q_new, v, in_w, in_b, out_w, out_b, ln2[0], ln2[1], n_heads)
    return q_new, k_new


# ----------------------------------------------------------------------------
# Main
# ----------------------------------------------------------------------------
if __name__ == "__main__":
    B, L, E, H = 2, 8, 32, 4   # batch, seq, embed_dim, n_heads (head_dim = 8)

    root = jax.random.PRNGKey(0)
    kq, kk, kv, kw_in, kb_in, kw_out, kb_out = jax.random.split(root, 7)

    # Inputs (batch_first layout (B, L, E)).
    q = jax.random.normal(kq, (B, L, E), dtype=jnp.float32)
    k = jax.random.normal(kk, (B, L, E), dtype=jnp.float32)
    v = jax.random.normal(kv, (B, L, E), dtype=jnp.float32)

    # Deterministic synthetic MultiheadAttention parameters (PyTorch shapes).
    in_proj_weight = 0.05 * jax.random.normal(kw_in, (3 * E, E), dtype=jnp.float32)
    in_proj_bias = 0.05 * jax.random.normal(kb_in, (3 * E,), dtype=jnp.float32)
    out_proj_weight = 0.05 * jax.random.normal(kw_out, (E, E), dtype=jnp.float32)
    out_proj_bias = 0.05 * jax.random.normal(kb_out, (E,), dtype=jnp.float32)

    # LayerNorm params (PyTorch default init: gamma=1, beta=0).
    g1, b1 = jnp.ones((E,), jnp.float32), jnp.zeros((E,), jnp.float32)
    g2, b2 = jnp.ones((E,), jnp.float32), jnp.zeros((E,), jnp.float32)

    # Host-side repack into dense slabs (scale folded into Wq/bq).
    w, vec = prepare_params(
        in_proj_weight, in_proj_bias, out_proj_weight, out_proj_bias,
        g1, b1, g2, b2, H)

    q_out, k_out = cross_attention(q, k, v, w, vec, H)
    q_out, k_out = jax.block_until_ready((q_out, k_out))

    # Validate against the pure-JAX reference of the PyTorch math.
    q_ref, k_ref = _ref_cross_attention(
        q, k, v, in_proj_weight, in_proj_bias, out_proj_weight, out_proj_bias,
        (g1, b1), (g2, b2), H)
    np.testing.assert_allclose(np.asarray(q_out), np.asarray(q_ref), rtol=1e-4, atol=1e-4)
    np.testing.assert_allclose(np.asarray(k_out), np.asarray(k_ref), rtol=1e-4, atol=1e-4)

    print("KERNEL_OK")
</pallas_src>

<mosaic_0001>
module attributes {stable_mosaic.version = 11 : i64} {
  func.func @_cross_attention_kernel(%arg0: i32, %arg1: memref<2x8x32xf32, #tpu.memory_space<vmem>>, %arg2: memref<2x8x32xf32, #tpu.memory_space<vmem>>, %arg3: memref<2x8x32xf32, #tpu.memory_space<vmem>>, %arg4: memref<4x32x32xf32, #tpu.memory_space<vmem>>, %arg5: memref<8x32xf32, #tpu.memory_space<vmem>>, %arg6: memref<2x8x32xf32, #tpu.memory_space<vmem>>, %arg7: memref<2x8x32xf32, #tpu.memory_space<vmem>>, %arg8: memref<2x8x32xf32, #tpu.memory_space<vmem>>) attributes {dimension_semantics = [#tpu.dimension_semantics<parallel>], iteration_bounds = array<i64: 1>, scalar_prefetch = 0 : i64, scratch_operands = 1 : i64, tpu.core_type = #tpu.core_type<tc>, window_params = [{transform_indices = @transform_0, window_bounds = array<i64: 2, 8, 32>}, {transform_indices = @transform_1, window_bounds = array<i64: 2, 8, 32>}, {transform_indices = @transform_2, window_bounds = array<i64: 2, 8, 32>}, {pipeline_mode = #tpu.pipeline_mode<synchronous>, transform_indices = @transform_3, window_bounds = array<i64: 4, 32, 32>}, {pipeline_mode = #tpu.pipeline_mode<synchronous>, transform_indices = @transform_4, window_bounds = array<i64: 8, 32>}, {transform_indices = @transform_5, window_bounds = array<i64: 2, 8, 32>}, {transform_indices = @transform_6, window_bounds = array<i64: 2, 8, 32>}]} {
    %c0 = arith.constant 0 : index
    %c0_0 = arith.constant 0 : index
    %c0_1 = arith.constant 0 : index
    %0 = vector.load %arg4[%c0, %c0_0, %c0_1] : memref<4x32x32xf32, #tpu.memory_space<vmem>>, vector<1x32x32xf32>
    %1 = vector.shape_cast %0 : vector<1x32x32xf32> to vector<32x32xf32>
    %c1 = arith.constant 1 : index
    %c0_2 = arith.constant 0 : index
    %c0_3 = arith.constant 0 : index
    %2 = vector.load %arg4[%c1, %c0_2, %c0_3] : memref<4x32x32xf32, #tpu.memory_space<vmem>>, vector<1x32x32xf32>
    %3 = vector.shape_cast %2 : vector<1x32x32xf32> to vector<32x32xf32>
    %c2 = arith.constant 2 : index
    %c0_4 = arith.constant 0 : index
    %c0_5 = arith.constant 0 : index
    %4 = vector.load %arg4[%c2, %c0_4, %c0_5] : memref<4x32x32xf32, #tpu.memory_space<vmem>>, vector<1x32x32xf32>
    %5 = vector.shape_cast %4 : vector<1x32x32xf32> to vector<32x32xf32>
    %c3 = arith.constant 3 : index
    %c0_6 = arith.constant 0 : index
    %c0_7 = arith.constant 0 : index
    %6 = vector.load %arg4[%c3, %c0_6, %c0_7] : memref<4x32x32xf32, #tpu.memory_space<vmem>>, vector<1x32x32xf32>
    %7 = vector.shape_cast %6 : vector<1x32x32xf32> to vector<32x32xf32>
    %c0_8 = arith.constant 0 : index
    %c0_9 = arith.constant 0 : index
    %8 = vector.load %arg5[%c0_8, %c0_9] : memref<8x32xf32, #tpu.memory_space<vmem>>, vector<1x32xf32>
    %c1_10 = arith.constant 1 : index
    %c0_11 = arith.constant 0 : index
    %9 = vector.load %arg5[%c1_10, %c0_11] : memref<8x32xf32, #tpu.memory_space<vmem>>, vector<1x32xf32>
    %c2_12 = arith.constant 2 : index
    %c0_13 = arith.constant 0 : index
    %10 = vector.load %arg5[%c2_12, %c0_13] : memref<8x32xf32, #tpu.memory_space<vmem>>, vector<1x32xf32>
    %c3_14 = arith.constant 3 : index
    %c0_15 = arith.constant 0 : index
    %11 = vector.load %arg5[%c3_14, %c0_15] : memref<8x32xf32, #tpu.memory_space<vmem>>, vector<1x32xf32>
    %c4 = arith.constant 4 : index
    %c0_16 = arith.constant 0 : index
    %12 = vector.load %arg5[%c4, %c0_16] : memref<8x32xf32, #tpu.memory_space<vmem>>, vector<1x32xf32>
    %c5 = arith.constant 5 : index
    %c0_17 = arith.constant 0 : index
    %13 = vector.load %arg5[%c5, %c0_17] : memref<8x32xf32, #tpu.memory_space<vmem>>, vector<1x32xf32>
    %c6 = arith.constant 6 : index
    %c0_18 = arith.constant 0 : index
    %14 = vector.load %arg5[%c6, %c0_18] : memref<8x32xf32, #tpu.memory_space<vmem>>, vector<1x32xf32>
    %c7 = arith.constant 7 : index
    %c0_19 = arith.constant 0 : index
    %15 = vector.load %arg5[%c7, %c0_19] : memref<8x32xf32, #tpu.memory_space<vmem>>, vector<1x32xf32>
    %c0_20 = arith.constant 0 : index
    %c0_21 = arith.constant 0 : index
    %c0_22 = arith.constant 0 : index
    %16 = vector.load %arg1[%c0_20, %c0_21, %c0_22] : memref<2x8x32xf32, #tpu.memory_space<vmem>>, vector<2x8x32xf32>
    %17 = vector.shape_cast %16 : vector<2x8x32xf32> to vector<16x32xf32>
    %c0_23 = arith.constant 0 : index
    %c0_24 = arith.constant 0 : index
    %c0_25 = arith.constant 0 : index
    %18 = vector.load %arg2[%c0_23, %c0_24, %c0_25] : memref<2x8x32xf32, #tpu.memory_space<vmem>>, vector<2x8x32xf32>
    %19 = vector.shape_cast %18 : vector<2x8x32xf32> to vector<16x32xf32>
    %c0_26 = arith.constant 0 : index
    %c0_27 = arith.constant 0 : index
    %c0_28 = arith.constant 0 : index
    %20 = vector.load %arg3[%c0_26, %c0_27, %c0_28] : memref<2x8x32xf32, #tpu.memory_space<vmem>>, vector<2x8x32xf32>
    %21 = vector.shape_cast %20 : vector<2x8x32xf32> to vector<16x32xf32>
    %cst = arith.constant dense<0.000000e+00> : vector<16x32xf32>
    %22 = tpu.matmul %17, %1, %cst {dimension_numbers = #tpu.dot_dimension_numbers<[1], [0], [0], [1], [0, 0, 1, 1], [], []>} : vector<16x32xf32>, vector<32x32xf32>, vector<16x32xf32> -> vector<16x32xf32>
    %23 = vector.broadcast %8 : vector<1x32xf32> to vector<16x32xf32>
    %24 = arith.addf %22, %23 : vector<16x32xf32>
    %cst_29 = arith.constant dense<0.000000e+00> : vector<16x32xf32>
    %25 = tpu.matmul %19, %3, %cst_29 {dimension_numbers = #tpu.dot_dimension_numbers<[1], [0], [0], [1], [0, 0, 1, 1], [], []>} : vector<16x32xf32>, vector<32x32xf32>, vector<16x32xf32> -> vector<16x32xf32>
    %26 = vector.broadcast %9 : vector<1x32xf32> to vector<16x32xf32>
    %27 = arith.addf %25, %26 : vector<16x32xf32>
    %cst_30 = arith.constant dense<0.000000e+00> : vector<16x32xf32>
    %28 = tpu.matmul %21, %5, %cst_30 {dimension_numbers = #tpu.dot_dimension_numbers<[1], [0], [0], [1], [0, 0, 1, 1], [], []>} : vector<16x32xf32>, vector<32x32xf32>, vector<16x32xf32> -> vector<16x32xf32>
    %29 = vector.broadcast %10 : vector<1x32xf32> to vector<16x32xf32>
    %30 = arith.addf %28, %29 : vector<16x32xf32>
    %cst_31 = arith.constant dense<0.000000e+00> : vector<16x32xf32>
    %31 = tpu.matmul %19, %1, %cst_31 {dimension_numbers = #tpu.dot_dimension_numbers<[1], [0], [0], [1], [0, 0, 1, 1], [], []>} : vector<16x32xf32>, vector<32x32xf32>, vector<16x32xf32> -> vector<16x32xf32>
    %32 = vector.broadcast %8 : vector<1x32xf32> to vector<16x32xf32>
    %33 = arith.addf %31, %32 : vector<16x32xf32>
    %34 = vector.shape_cast %30 : vector<16x32xf32> to vector<2x8x32xf32>
    %35 = vector.shape_cast %24 : vector<16x32xf32> to vector<2x8x32xf32>
    %36 = vector.shape_cast %27 : vector<16x32xf32> to vector<2x8x32xf32>
    %37 = vector.extract_strided_slice %35 {offsets = [0, 0, 0], sizes = [2, 8, 8], strides = [1, 1, 1]} : vector<2x8x32xf32> to vector<2x8x8xf32>
    %38 = vector.extract_strided_slice %36 {offsets = [0, 0, 0], sizes = [2, 8, 8], strides = [1, 1, 1]} : vector<2x8x32xf32> to vector<2x8x8xf32>
    %39 = vector.extract_strided_slice %34 {offsets = [0, 0, 0], sizes = [2, 8, 8], strides = [1, 1, 1]} : vector<2x8x32xf32> to vector<2x8x8xf32>
    "tpu.trace_start"() <{level = 10 : i32, message = "bqd,bkd->bqk"}> : () -> ()
    %cst_32 = arith.constant dense<0.000000e+00> : vector<2x8x8xf32>
    %40 = tpu.matmul %37, %38, %cst_32 {dimension_numbers = #tpu.dot_dimension_numbers<[2], [2], [1], [1], [0, 0, 0, 1, 1, 1], [0], [0]>} : vector<2x8x8xf32>, vector<2x8x8xf32>, vector<2x8x8xf32> -> vector<2x8x8xf32>
    "tpu.trace_stop"() : () -> ()
    %cst_33 = arith.constant dense<0xFF800000> : vector<2x8xf32>
    %41 = vector.multi_reduction <maximumf>, %40, %cst_33 [2] : vector<2x8x8xf32> to vector<2x8xf32>
    %42 = vector.shape_cast %41 : vector<2x8xf32> to vector<2x8x1xf32>
    %43 = vector.broadcast %42 : vector<2x8x1xf32> to vector<2x8x8xf32>
    %44 = arith.subf %40, %43 : vector<2x8x8xf32>
    %45 = math.exp %44 : vector<2x8x8xf32>
    %cst_34 = arith.constant dense<0.000000e+00> : vector<2x8xf32>
    %46 = vector.multi_reduction <add>, %45, %cst_34 [2] : vector<2x8x8xf32> to vector<2x8xf32>
    %47 = vector.shape_cast %46 : vector<2x8xf32> to vector<2x8x1xf32>
    %48 = tpu.reciprocal %47 : vector<2x8x1xf32> -> vector<2x8x1xf32>
    %49 = vector.broadcast %48 : vector<2x8x1xf32> to vector<2x8x8xf32>
    %50 = arith.mulf %45, %49 : vector<2x8x8xf32>
    "tpu.trace_start"() <{level = 10 : i32, message = "bqk,bkd->bqd"}> : () -> ()
    %cst_35 = arith.constant dense<0.000000e+00> : vector<2x8x8xf32>
    %51 = tpu.matmul %50, %39, %cst_35 {dimension_numbers = #tpu.dot_dimension_numbers<[2], [1], [1], [2], [0, 0, 0, 1, 1, 2], [0], [0]>} : vector<2x8x8xf32>, vector<2x8x8xf32>, vector<2x8x8xf32> -> vector<2x8x8xf32>
    "tpu.trace_stop"() : () -> ()
    %c0_36 = arith.constant 0 : index
    %c0_37 = arith.constant 0 : index
    %c0_38 = arith.constant 0 : index
    %52 = vector.load %arg8[%c0_36, %c0_37, %c0_38] : memref<2x8x32xf32, #tpu.memory_space<vmem>>, vector<2x8x8xf32>
    tpu.vector_store %arg8[%c0_36, %c0_37, %c0_38], %51 {strides = array<i32>} : memref<2x8x32xf32, #tpu.memory_space<vmem>>, vector<2x8x8xf32>,
    %53 = vector.extract_strided_slice %35 {offsets = [0, 0, 8], sizes = [2, 8, 8], strides = [1, 1, 1]} : vector<2x8x32xf32> to vector<2x8x8xf32>
    %54 = vector.extract_strided_slice %36 {offsets = [0, 0, 8], sizes = [2, 8, 8], strides = [1, 1, 1]} : vector<2x8x32xf32> to vector<2x8x8xf32>
    %55 = vector.extract_strided_slice %34 {offsets = [0, 0, 8], sizes = [2, 8, 8], strides = [1, 1, 1]} : vector<2x8x32xf32> to vector<2x8x8xf32>
    "tpu.trace_start"() <{level = 10 : i32, message = "bqd,bkd->bqk"}> : () -> ()
    %cst_39 = arith.constant dense<0.000000e+00> : vector<2x8x8xf32>
    %56 = tpu.matmul %53, %54, %cst_39 {dimension_numbers = #tpu.dot_dimension_numbers<[2], [2], [1], [1], [0, 0, 0, 1, 1, 1], [0], [0]>} : vector<2x8x8xf32>, vector<2x8x8xf32>, vector<2x8x8xf32> -> vector<2x8x8xf32>
    "tpu.trace_stop"() : () -> ()
    %cst_40 = arith.constant dense<0xFF800000> : vector<2x8xf32>
    %57 = vector.multi_reduction <maximumf>, %56, %cst_40 [2] : vector<2x8x8xf32> to vector<2x8xf32>
    %58 = vector.shape_cast %57 : vector<2x8xf32> to vector<2x8x1xf32>
    %59 = vector.broadcast %58 : vector<2x8x1xf32> to vector<2x8x8xf32>
    %60 = arith.subf %56, %59 : vector<2x8x8xf32>
    %61 = math.exp %60 : vector<2x8x8xf32>
    %cst_41 = arith.constant dense<0.000000e+00> : vector<2x8xf32>
    %62 = vector.multi_reduction <add>, %61, %cst_41 [2] : vector<2x8x8xf32> to vector<2x8xf32>
    %63 = vector.shape_cast %62 : vector<2x8xf32> to vector<2x8x1xf32>
    %64 = tpu.reciprocal %63 : vector<2x8x1xf32> -> vector<2x8x1xf32>
    %65 = vector.broadcast %64 : vector<2x8x1xf32> to vector<2x8x8xf32>
    %66 = arith.mulf %61, %65 : vector<2x8x8xf32>
    "tpu.trace_start"() <{level = 10 : i32, message = "bqk,bkd->bqd"}> : () -> ()
    %cst_42 = arith.constant dense<0.000000e+00> : vector<2x8x8xf32>
    %67 = tpu.matmul %66, %55, %cst_42 {dimension_numbers = #tpu.dot_dimension_numbers<[2], [1], [1], [2], [0, 0, 0, 1, 1, 2], [0], [0]>} : vector<2x8x8xf32>, vector<2x8x8xf32>, vector<2x8x8xf32> -> vector<2x8x8xf32>
    "tpu.trace_stop"() : () -> ()
    %c0_43 = arith.constant 0 : index
    %c0_44 = arith.constant 0 : index
    %c8 = arith.constant 8 : index
    %68 = vector.load %arg8[%c0_43, %c0_44, %c8] : memref<2x8x32xf32, #tpu.memory_space<vmem>>, vector<2x8x8xf32>
    tpu.vector_store %arg8[%c0_43, %c0_44, %c8], %67 {strides = array<i32>} : memref<2x8x32xf32, #tpu.memory_space<vmem>>, vector<2x8x8xf32>,
    %69 = vector.extract_strided_slice %35 {offsets = [0, 0, 16], sizes = [2, 8, 8], strides = [1, 1, 1]} : vector<2x8x32xf32> to vector<2x8x8xf32>
    %70 = vector.extract_strided_slice %36 {offsets = [0, 0, 16], sizes = [2, 8, 8], strides = [1, 1, 1]} : vector<2x8x32xf32> to vector<2x8x8xf32>
    %71 = vector.extract_strided_slice %34 {offsets = [0, 0, 16], sizes = [2, 8, 8], strides = [1, 1, 1]} : vector<2x8x32xf32> to vector<2x8x8xf32>
    "tpu.trace_start"() <{level = 10 : i32, message = "bqd,bkd->bqk"}> : () -> ()
    %cst_45 = arith.constant dense<0.000000e+00> : vector<2x8x8xf32>
    %72 = tpu.matmul %69, %70, %cst_45 {dimension_numbers = #tpu.dot_dimension_numbers<[2], [2], [1], [1], [0, 0, 0, 1, 1, 1], [0], [0]>} : vector<2x8x8xf32>, vector<2x8x8xf32>, vector<2x8x8xf32> -> vector<2x8x8xf32>
    "tpu.trace_stop"() : () -> ()
    %cst_46 = arith.constant dense<0xFF800000> : vector<2x8xf32>
    %73 = vector.multi_reduction <maximumf>, %72, %cst_46 [2] : vector<2x8x8xf32> to vector<2x8xf32>
    %74 = vector.shape_cast %73 : vector<2x8xf32> to vector<2x8x1xf32>
    %75 = vector.broadcast %74 : vector<2x8x1xf32> to vector<2x8x8xf32>
    %76 = arith.subf %72, %75 : vector<2x8x8xf32>
    %77 = math.exp %76 : vector<2x8x8xf32>
    %cst_47 = arith.constant dense<0.000000e+00> : vector<2x8xf32>
    %78 = vector.multi_reduction <add>, %77, %cst_47 [2] : vector<2x8x8xf32> to vector<2x8xf32>
    %79 = vector.shape_cast %78 : vector<2x8xf32> to vector<2x8x1xf32>
    %80 = tpu.reciprocal %79 : vector<2x8x1xf32> -> vector<2x8x1xf32>
    %81 = vector.broadcast %80 : vector<2x8x1xf32> to vector<2x8x8xf32>
    %82 = arith.mulf %77, %81 : vector<2x8x8xf32>
    "tpu.trace_start"() <{level = 10 : i32, message = "bqk,bkd->bqd"}> : () -> ()
    %cst_48 = arith.constant dense<0.000000e+00> : vector<2x8x8xf32>
    %83 = tpu.matmul %82, %71, %cst_48 {dimension_numbers = #tpu.dot_dimension_numbers<[2], [1], [1], [2], [0, 0, 0, 1, 1, 2], [0], [0]>} : vector<2x8x8xf32>, vector<2x8x8xf32>, vector<2x8x8xf32> -> vector<2x8x8xf32>
    "tpu.trace_stop"() : () -> ()
    %c0_49 = arith.constant 0 : index
    %c0_50 = arith.constant 0 : index
    %c16 = arith.constant 16 : index
    %84 = vector.load %arg8[%c0_49, %c0_50, %c16] : memref<2x8x32xf32, #tpu.memory_space<vmem>>, vector<2x8x8xf32>
    tpu.vector_store %arg8[%c0_49, %c0_50, %c16], %83 {strides = array<i32>} : memref<2x8x32xf32, #tpu.memory_space<vmem>>, vector<2x8x8xf32>,
    %85 = vector.extract_strided_slice %35 {offsets = [0, 0, 24], sizes = [2, 8, 8], strides = [1, 1, 1]} : vector<2x8x32xf32> to vector<2x8x8xf32>
    %86 = vector.extract_strided_slice %36 {offsets = [0, 0, 24], sizes = [2, 8, 8], strides = [1, 1, 1]} : vector<2x8x32xf32> to vector<2x8x8xf32>
    %87 = vector.extract_strided_slice %34 {offsets = [0, 0, 24], sizes = [2, 8, 8], strides = [1, 1, 1]} : vector<2x8x32xf32> to vector<2x8x8xf32>
    "tpu.trace_start"() <{level = 10 : i32, message = "bqd,bkd->bqk"}> : () -> ()
    %cst_51 = arith.constant dense<0.000000e+00> : vector<2x8x8xf32>
    %88 = tpu.matmul %85, %86, %cst_51 {dimension_numbers = #tpu.dot_dimension_numbers<[2], [2], [1], [1], [0, 0, 0, 1, 1, 1], [0], [0]>} : vector<2x8x8xf32>, vector<2x8x8xf32>, vector<2x8x8xf32> -> vector<2x8x8xf32>
    "tpu.trace_stop"() : () -> ()
    %cst_52 = arith.constant dense<0xFF800000> : vector<2x8xf32>
    %89 = vector.multi_reduction <maximumf>, %88, %cst_52 [2] : vector<2x8x8xf32> to vector<2x8xf32>
    %90 = vector.shape_cast %89 : vector<2x8xf32> to vector<2x8x1xf32>
    %91 = vector.broadcast %90 : vector<2x8x1xf32> to vector<2x8x8xf32>
    %92 = arith.subf %88, %91 : vector<2x8x8xf32>
    %93 = math.exp %92 : vector<2x8x8xf32>
    %cst_53 = arith.constant dense<0.000000e+00> : vector<2x8xf32>
    %94 = vector.multi_reduction <add>, %93, %cst_53 [2] : vector<2x8x8xf32> to vector<2x8xf32>
    %95 = vector.shape_cast %94 : vector<2x8xf32> to vector<2x8x1xf32>
    %96 = tpu.reciprocal %95 : vector<2x8x1xf32> -> vector<2x8x1xf32>
    %97 = vector.broadcast %96 : vector<2x8x1xf32> to vector<2x8x8xf32>
    %98 = arith.mulf %93, %97 : vector<2x8x8xf32>
    "tpu.trace_start"() <{level = 10 : i32, message = "bqk,bkd->bqd"}> : () -> ()
    %cst_54 = arith.constant dense<0.000000e+00> : vector<2x8x8xf32>
    %99 = tpu.matmul %98, %87, %cst_54 {dimension_numbers = #tpu.dot_dimension_numbers<[2], [1], [1], [2], [0, 0, 0, 1, 1, 2], [0], [0]>} : vector<2x8x8xf32>, vector<2x8x8xf32>, vector<2x8x8xf32> -> vector<2x8x8xf32>
    "tpu.trace_stop"() : () -> ()
    %c0_55 = arith.constant 0 : index
    %c0_56 = arith.constant 0 : index
    %c24 = arith.constant 24 : index
    %100 = vector.load %arg8[%c0_55, %c0_56, %c24] : memref<2x8x32xf32, #tpu.memory_space<vmem>>, vector<2x8x8xf32>
    tpu.vector_store %arg8[%c0_55, %c0_56, %c24], %99 {strides = array<i32>} : memref<2x8x32xf32, #tpu.memory_space<vmem>>, vector<2x8x8xf32>,
    %c0_57 = arith.constant 0 : index
    %c0_58 = arith.constant 0 : index
    %c0_59 = arith.constant 0 : index
    %101 = vector.load %arg8[%c0_57, %c0_58, %c0_59] : memref<2x8x32xf32, #tpu.memory_space<vmem>>, vector<2x8x32xf32>
    %102 = vector.shape_cast %101 : vector<2x8x32xf32> to vector<16x32xf32>
    %cst_60 = arith.constant dense<0.000000e+00> : vector<16x32xf32>
    %103 = tpu.matmul %102, %7, %cst_60 {dimension_numbers = #tpu.dot_dimension_numbers<[1], [0], [0], [1], [0, 0, 1, 1], [], []>} : vector<16x32xf32>, vector<32x32xf32>, vector<16x32xf32> -> vector<16x32xf32>
    %104 = vector.broadcast %11 : vector<1x32xf32> to vector<16x32xf32>
    %105 = arith.addf %103, %104 : vector<16x32xf32>
    %106 = arith.addf %17, %105 : vector<16x32xf32>
    %cst_61 = arith.constant dense<0.000000e+00> : vector<16xf32>
    %107 = vector.multi_reduction <add>, %106, %cst_61 [1] : vector<16x32xf32> to vector<16xf32>
    %108 = vector.shape_cast %107 : vector<16xf32> to vector<16x1xf32>
    %cst_62 = arith.constant 3.200000e+01 : f32
    %109 = vector.broadcast %cst_62 : f32 to vector<16x1xf32>
    %110 = arith.divf %108, %109 : vector<16x1xf32>
    %111 = vector.broadcast %110 : vector<16x1xf32> to vector<16x32xf32>
    %112 = arith.subf %106, %111 : vector<16x32xf32>
    %113 = vector.broadcast %110 : vector<16x1xf32> to vector<16x32xf32>
    %114 = arith.subf %106, %113 : vector<16x32xf32>
    %115 = arith.mulf %112, %114 : vector<16x32xf32>
    %cst_63 = arith.constant dense<0.000000e+00> : vector<16xf32>
    %116 = vector.multi_reduction <add>, %115, %cst_63 [1] : vector<16x32xf32> to vector<16xf32>
    %117 = vector.shape_cast %116 : vector<16xf32> to vector<16x1xf32>
    %cst_64 = arith.constant 3.200000e+01 : f32
    %118 = vector.broadcast %cst_64 : f32 to vector<16x1xf32>
    %119 = arith.divf %117, %118 : vector<16x1xf32>
    %120 = vector.broadcast %110 : vector<16x1xf32> to vector<16x32xf32>
    %121 = arith.subf %106, %120 : vector<16x32xf32>
    %cst_65 = arith.constant 9.99999974E-6 : f32
    %122 = vector.broadcast %cst_65 : f32 to vector<16x1xf32>
    %123 = arith.addf %119, %122 : vector<16x1xf32>
    %124 = math.rsqrt %123 : vector<16x1xf32>
    %125 = vector.broadcast %124 : vector<16x1xf32> to vector<16x32xf32>
    %126 = arith.mulf %121, %125 : vector<16x32xf32>
    %127 = vector.broadcast %12 : vector<1x32xf32> to vector<16x32xf32>
    %128 = arith.mulf %126, %127 : vector<16x32xf32>
    %129 = vector.broadcast %13 : vector<1x32xf32> to vector<16x32xf32>
    %130 = arith.addf %128, %129 : vector<16x32xf32>
    %cst_66 = arith.constant dense<0.000000e+00> : vector<16x32xf32>
    %131 = tpu.matmul %130, %3, %cst_66 {dimension_numbers = #tpu.dot_dimension_numbers<[1], [0], [0], [1], [0, 0, 1, 1], [], []>} : vector<16x32xf32>, vector<32x32xf32>, vector<16x32xf32> -> vector<16x32xf32>
    %132 = vector.broadcast %9 : vector<1x32xf32> to vector<16x32xf32>
    %133 = arith.addf %131, %132 : vector<16x32xf32>
    %134 = vector.shape_cast %33 : vector<16x32xf32> to vector<2x8x32xf32>
    %135 = vector.shape_cast %133 : vector<16x32xf32> to vector<2x8x32xf32>
    %136 = vector.extract_strided_slice %134 {offsets = [0, 0, 0], sizes = [2, 8, 8], strides = [1, 1, 1]} : vector<2x8x32xf32> to vector<2x8x8xf32>
    %137 = vector.extract_strided_slice %135 {offsets = [0, 0, 0], sizes = [2, 8, 8], strides = [1, 1, 1]} : vector<2x8x32xf32> to vector<2x8x8xf32>
    %138 = vector.extract_strided_slice %34 {offsets = [0, 0, 0], sizes = [2, 8, 8], strides = [1, 1, 1]} : vector<2x8x32xf32> to vector<2x8x8xf32>
    "tpu.trace_start"() <{level = 10 : i32, message = "bqd,bkd->bqk"}> : () -> ()
    %cst_67 = arith.constant dense<0.000000e+00> : vector<2x8x8xf32>
    %139 = tpu.matmul %136, %137, %cst_67 {dimension_numbers = #tpu.dot_dimension_numbers<[2], [2], [1], [1], [0, 0, 0, 1, 1, 1], [0], [0]>} : vector<2x8x8xf32>, vector<2x8x8xf32>, vector<2x8x8xf32> -> vector<2x8x8xf32>
    "tpu.trace_stop"() : () -> ()
    %cst_68 = arith.constant dense<0xFF800000> : vector<2x8xf32>
    %140 = vector.multi_reduction <maximumf>, %139, %cst_68 [2] : vector<2x8x8xf32> to vector<2x8xf32>
    %141 = vector.shape_cast %140 : vector<2x8xf32> to vector<2x8x1xf32>
    %142 = vector.broadcast %141 : vector<2x8x1xf32> to vector<2x8x8xf32>
    %143 = arith.subf %139, %142 : vector<2x8x8xf32>
    %144 = math.exp %143 : vector<2x8x8xf32>
    %cst_69 = arith.constant dense<0.000000e+00> : vector<2x8xf32>
    %145 = vector.multi_reduction <add>, %144, %cst_69 [2] : vector<2x8x8xf32> to vector<2x8xf32>
    %146 = vector.shape_cast %145 : vector<2x8xf32> to vector<2x8x1xf32>
    %147 = tpu.reciprocal %146 : vector<2x8x1xf32> -> vector<2x8x1xf32>
    %148 = vector.broadcast %147 : vector<2x8x1xf32> to vector<2x8x8xf32>
    %149 = arith.mulf %144, %148 : vector<2x8x8xf32>
    "tpu.trace_start"() <{level = 10 : i32, message = "bqk,bkd->bqd"}> : () -> ()
    %cst_70 = arith.constant dense<0.000000e+00> : vector<2x8x8xf32>
    %150 = tpu.matmul %149, %138, %cst_70 {dimension_numbers = #tpu.dot_dimension_numbers<[2], [1], [1], [2], [0, 0, 0, 1, 1, 2], [0], [0]>} : vector<2x8x8xf32>, vector<2x8x8xf32>, vector<2x8x8xf32> -> vector<2x8x8xf32>
    "tpu.trace_stop"() : () -> ()
    %c0_71 = arith.constant 0 : index
    %c0_72 = arith.constant 0 : index
    %c0_73 = arith.constant 0 : index
    %151 = vector.load %arg8[%c0_71, %c0_72, %c0_73] : memref<2x8x32xf32, #tpu.memory_space<vmem>>, vector<2x8x8xf32>
    tpu.vector_store %arg8[%c0_71, %c0_72, %c0_73], %150 {strides = array<i32>} : memref<2x8x32xf32, #tpu.memory_space<vmem>>, vector<2x8x8xf32>,
    %152 = vector.extract_strided_slice %134 {offsets = [0, 0, 8], sizes = [2, 8, 8], strides = [1, 1, 1]} : vector<2x8x32xf32> to vector<2x8x8xf32>
    %153 = vector.extract_strided_slice %135 {offsets = [0, 0, 8], sizes = [2, 8, 8], strides = [1, 1, 1]} : vector<2x8x32xf32> to vector<2x8x8xf32>
    %154 = vector.extract_strided_slice %34 {offsets = [0, 0, 8], sizes = [2, 8, 8], strides = [1, 1, 1]} : vector<2x8x32xf32> to vector<2x8x8xf32>
    "tpu.trace_start"() <{level = 10 : i32, message = "bqd,bkd->bqk"}> : () -> ()
    %cst_74 = arith.constant dense<0.000000e+00> : vector<2x8x8xf32>
    %155 = tpu.matmul %152, %153, %cst_74 {dimension_numbers = #tpu.dot_dimension_numbers<[2], [2], [1], [1], [0, 0, 0, 1, 1, 1], [0], [0]>} : vector<2x8x8xf32>, vector<2x8x8xf32>, vector<2x8x8xf32> -> vector<2x8x8xf32>
    "tpu.trace_stop"() : () -> ()
    %cst_75 = arith.constant dense<0xFF800000> : vector<2x8xf32>
    %156 = vector.multi_reduction <maximumf>, %155, %cst_75 [2] : vector<2x8x8xf32> to vector<2x8xf32>
    %157 = vector.shape_cast %156 : vector<2x8xf32> to vector<2x8x1xf32>
    %158 = vector.broadcast %157 : vector<2x8x1xf32> to vector<2x8x8xf32>
    %159 = arith.subf %155, %158 : vector<2x8x8xf32>
    %160 = math.exp %159 : vector<2x8x8xf32>
    %cst_76 = arith.constant dense<0.000000e+00> : vector<2x8xf32>
    %161 = vector.multi_reduction <add>, %160, %cst_76 [2] : vector<2x8x8xf32> to vector<2x8xf32>
    %162 = vector.shape_cast %161 : vector<2x8xf32> to vector<2x8x1xf32>
    %163 = tpu.reciprocal %162 : vector<2x8x1xf32> -> vector<2x8x1xf32>
    %164 = vector.broadcast %163 : vector<2x8x1xf32> to vector<2x8x8xf32>
    %165 = arith.mulf %160, %164 : vector<2x8x8xf32>
    "tpu.trace_start"() <{level = 10 : i32, message = "bqk,bkd->bqd"}> : () -> ()
    %cst_77 = arith.constant dense<0.000000e+00> : vector<2x8x8xf32>
    %166 = tpu.matmul %165, %154, %cst_77 {dimension_numbers = #tpu.dot_dimension_numbers<[2], [1], [1], [2], [0, 0, 0, 1, 1, 2], [0], [0]>} : vector<2x8x8xf32>, vector<2x8x8xf32>, vector<2x8x8xf32> -> vector<2x8x8xf32>
    "tpu.trace_stop"() : () -> ()
    %c0_78 = arith.constant 0 : index
    %c0_79 = arith.constant 0 : index
    %c8_80 = arith.constant 8 : index
    %167 = vector.load %arg8[%c0_78, %c0_79, %c8_80] : memref<2x8x32xf32, #tpu.memory_space<vmem>>, vector<2x8x8xf32>
    tpu.vector_store %arg8[%c0_78, %c0_79, %c8_80], %166 {strides = array<i32>} : memref<2x8x32xf32, #tpu.memory_space<vmem>>, vector<2x8x8xf32>,
    %168 = vector.extract_strided_slice %134 {offsets = [0, 0, 16], sizes = [2, 8, 8], strides = [1, 1, 1]} : vector<2x8x32xf32> to vector<2x8x8xf32>
    %169 = vector.extract_strided_slice %135 {offsets = [0, 0, 16], sizes = [2, 8, 8], strides = [1, 1, 1]} : vector<2x8x32xf32> to vector<2x8x8xf32>
    %170 = vector.extract_strided_slice %34 {offsets = [0, 0, 16], sizes = [2, 8, 8], strides = [1, 1, 1]} : vector<2x8x32xf32> to vector<2x8x8xf32>
    "tpu.trace_start"() <{level = 10 : i32, message = "bqd,bkd->bqk"}> : () -> ()
    %cst_81 = arith.constant dense<0.000000e+00> : vector<2x8x8xf32>
    %171 = tpu.matmul %168, %169, %cst_81 {dimension_numbers = #tpu.dot_dimension_numbers<[2], [2], [1], [1], [0, 0, 0, 1, 1, 1], [0], [0]>} : vector<2x8x8xf32>, vector<2x8x8xf32>, vector<2x8x8xf32> -> vector<2x8x8xf32>
    "tpu.trace_stop"() : () -> ()
    %cst_82 = arith.constant dense<0xFF800000> : vector<2x8xf32>
    %172 = vector.multi_reduction <maximumf>, %171, %cst_82 [2] : vector<2x8x8xf32> to vector<2x8xf32>
    %173 = vector.shape_cast %172 : vector<2x8xf32> to vector<2x8x1xf32>
    %174 = vector.broadcast %173 : vector<2x8x1xf32> to vector<2x8x8xf32>
    %175 = arith.subf %171, %174 : vector<2x8x8xf32>
    %176 = math.exp %175 : vector<2x8x8xf32>
    %cst_83 = arith.constant dense<0.000000e+00> : vector<2x8xf32>
    %177 = vector.multi_reduction <add>, %176, %cst_83 [2] : vector<2x8x8xf32> to vector<2x8xf32>
    %178 = vector.shape_cast %177 : vector<2x8xf32> to vector<2x8x1xf32>
    %179 = tpu.reciprocal %178 : vector<2x8x1xf32> -> vector<2x8x1xf32>
    %180 = vector.broadcast %179 : vector<2x8x1xf32> to vector<2x8x8xf32>
    %181 = arith.mulf %176, %180 : vector<2x8x8xf32>
    "tpu.trace_start"() <{level = 10 : i32, message = "bqk,bkd->bqd"}> : () -> ()
    %cst_84 = arith.constant dense<0.000000e+00> : vector<2x8x8xf32>
    %182 = tpu.matmul %181, %170, %cst_84 {dimension_numbers = #tpu.dot_dimension_numbers<[2], [1], [1], [2], [0, 0, 0, 1, 1, 2], [0], [0]>} : vector<2x8x8xf32>, vector<2x8x8xf32>, vector<2x8x8xf32> -> vector<2x8x8xf32>
    "tpu.trace_stop"() : () -> ()
    %c0_85 = arith.constant 0 : index
    %c0_86 = arith.constant 0 : index
    %c16_87 = arith.constant 16 : index
    %183 = vector.load %arg8[%c0_85, %c0_86, %c16_87] : memref<2x8x32xf32, #tpu.memory_space<vmem>>, vector<2x8x8xf32>
    tpu.vector_store %arg8[%c0_85, %c0_86, %c16_87], %182 {strides = array<i32>} : memref<2x8x32xf32, #tpu.memory_space<vmem>>, vector<2x8x8xf32>,
    %184 = vector.extract_strided_slice %134 {offsets = [0, 0, 24], sizes = [2, 8, 8], strides = [1, 1, 1]} : vector<2x8x32xf32> to vector<2x8x8xf32>
    %185 = vector.extract_strided_slice %135 {offsets = [0, 0, 24], sizes = [2, 8, 8], strides = [1, 1, 1]} : vector<2x8x32xf32> to vector<2x8x8xf32>
    %186 = vector.extract_strided_slice %34 {offsets = [0, 0, 24], sizes = [2, 8, 8], strides = [1, 1, 1]} : vector<2x8x32xf32> to vector<2x8x8xf32>
    "tpu.trace_start"() <{level = 10 : i32, message = "bqd,bkd->bqk"}> : () -> ()
    %cst_88 = arith.constant dense<0.000000e+00> : vector<2x8x8xf32>
    %187 = tpu.matmul %184, %185, %cst_88 {dimension_numbers = #tpu.dot_dimension_numbers<[2], [2], [1], [1], [0, 0, 0, 1, 1, 1], [0], [0]>} : vector<2x8x8xf32>, vector<2x8x8xf32>, vector<2x8x8xf32> -> vector<2x8x8xf32>
    "tpu.trace_stop"() : () -> ()
    %cst_89 = arith.constant dense<0xFF800000> : vector<2x8xf32>
    %188 = vector.multi_reduction <maximumf>, %187, %cst_89 [2] : vector<2x8x8xf32> to vector<2x8xf32>
    %189 = vector.shape_cast %188 : vector<2x8xf32> to vector<2x8x1xf32>
    %190 = vector.broadcast %189 : vector<2x8x1xf32> to vector<2x8x8xf32>
    %191 = arith.subf %187, %190 : vector<2x8x8xf32>
    %192 = math.exp %191 : vector<2x8x8xf32>
    %cst_90 = arith.constant dense<0.000000e+00> : vector<2x8xf32>
    %193 = vector.multi_reduction <add>, %192, %cst_90 [2] : vector<2x8x8xf32> to vector<2x8xf32>
    %194 = vector.shape_cast %193 : vector<2x8xf32> to vector<2x8x1xf32>
    %195 = tpu.reciprocal %194 : vector<2x8x1xf32> -> vector<2x8x1xf32>
    %196 = vector.broadcast %195 : vector<2x8x1xf32> to vector<2x8x8xf32>
    %197 = arith.mulf %192, %196 : vector<2x8x8xf32>
    "tpu.trace_start"() <{level = 10 : i32, message = "bqk,bkd->bqd"}> : () -> ()
    %cst_91 = arith.constant dense<0.000000e+00> : vector<2x8x8xf32>
    %198 = tpu.matmul %197, %186, %cst_91 {dimension_numbers = #tpu.dot_dimension_numbers<[2], [1], [1], [2], [0, 0, 0, 1, 1, 2], [0], [0]>} : vector<2x8x8xf32>, vector<2x8x8xf32>, vector<2x8x8xf32> -> vector<2x8x8xf32>
    "tpu.trace_stop"() : () -> ()
    %c0_92 = arith.constant 0 : index
    %c0_93 = arith.constant 0 : index
    %c24_94 = arith.constant 24 : index
    %199 = vector.load %arg8[%c0_92, %c0_93, %c24_94] : memref<2x8x32xf32, #tpu.memory_space<vmem>>, vector<2x8x8xf32>
    tpu.vector_store %arg8[%c0_92, %c0_93, %c24_94], %198 {strides = array<i32>} : memref<2x8x32xf32, #tpu.memory_space<vmem>>, vector<2x8x8xf32>,
    %c0_95 = arith.constant 0 : index
    %c0_96 = arith.constant 0 : index
    %c0_97 = arith.constant 0 : index
    %200 = vector.load %arg8[%c0_95, %c0_96, %c0_97] : memref<2x8x32xf32, #tpu.memory_space<vmem>>, vector<2x8x32xf32>
    %201 = vector.shape_cast %200 : vector<2x8x32xf32> to vector<16x32xf32>
    %cst_98 = arith.constant dense<0.000000e+00> : vector<16x32xf32>
    %202 = tpu.matmul %201, %7, %cst_98 {dimension_numbers = #tpu.dot_dimension_numbers<[1], [0], [0], [1], [0, 0, 1, 1], [], []>} : vector<16x32xf32>, vector<32x32xf32>, vector<16x32xf32> -> vector<16x32xf32>
    %203 = vector.broadcast %11 : vector<1x32xf32> to vector<16x32xf32>
    %204 = arith.addf %202, %203 : vector<16x32xf32>
    %205 = arith.addf %19, %204 : vector<16x32xf32>
    %cst_99 = arith.constant dense<0.000000e+00> : vector<16xf32>
    %206 = vector.multi_reduction <add>, %205, %cst_99 [1] : vector<16x32xf32> to vector<16xf32>
    %207 = vector.shape_cast %206 : vector<16xf32> to vector<16x1xf32>
    %cst_100 = arith.constant 3.200000e+01 : f32
    %208 = vector.broadcast %cst_100 : f32 to vector<16x1xf32>
    %209 = arith.divf %207, %208 : vector<16x1xf32>
    %210 = vector.broadcast %209 : vector<16x1xf32> to vector<16x32xf32>
    %211 = arith.subf %205, %210 : vector<16x32xf32>
    %212 = vector.broadcast %209 : vector<16x1xf32> to vector<16x32xf32>
    %213 = arith.subf %205, %212 : vector<16x32xf32>
    %214 = arith.mulf %211, %213 : vector<16x32xf32>
    %cst_101 = arith.constant dense<0.000000e+00> : vector<16xf32>
    %215 = vector.multi_reduction <add>, %214, %cst_101 [1] : vector<16x32xf32> to vector<16xf32>
    %216 = vector.shape_cast %215 : vector<16xf32> to vector<16x1xf32>
    %cst_102 = arith.constant 3.200000e+01 : f32
    %217 = vector.broadcast %cst_102 : f32 to vector<16x1xf32>
    %218 = arith.divf %216, %217 : vector<16x1xf32>
    %219 = vector.broadcast %209 : vector<16x1xf32> to vector<16x32xf32>
    %220 = arith.subf %205, %219 : vector<16x32xf32>
    %cst_103 = arith.constant 9.99999974E-6 : f32
    %221 = vector.broadcast %cst_103 : f32 to vector<16x1xf32>
    %222 = arith.addf %218, %221 : vector<16x1xf32>
    %223 = math.rsqrt %222 : vector<16x1xf32>
    %224 = vector.broadcast %223 : vector<16x1xf32> to vector<16x32xf32>
    %225 = arith.mulf %220, %224 : vector<16x32xf32>
    %226 = vector.broadcast %14 : vector<1x32xf32> to vector<16x32xf32>
    %227 = arith.mulf %225, %226 : vector<16x32xf32>
    %228 = vector.broadcast %15 : vector<1x32xf32> to vector<16x32xf32>
    %229 = arith.addf %227, %228 : vector<16x32xf32>
    %230 = vector.shape_cast %130 : vector<16x32xf32> to vector<2x8x32xf32>
    %c0_104 = arith.constant 0 : index
    %c0_105 = arith.constant 0 : index
    %c0_106 = arith.constant 0 : index
    %231 = vector.load %arg6[%c0_104, %c0_105, %c0_106] : memref<2x8x32xf32, #tpu.memory_space<vmem>>, vector<2x8x32xf32>
    tpu.vector_store %arg6[%c0_104, %c0_105, %c0_106], %230 {strides = array<i32>} : memref<2x8x32xf32, #tpu.memory_space<vmem>>, vector<2x8x32xf32>,
    %232 = vector.shape_cast %229 : vector<16x32xf32> to vector<2x8x32xf32>
    %c0_107 = arith.constant 0 : index
    %c0_108 = arith.constant 0 : index
    %c0_109 = arith.constant 0 : index
    %233 = vector.load %arg7[%c0_107, %c0_108, %c0_109] : memref<2x8x32xf32, #tpu.memory_space<vmem>>, vector<2x8x32xf32>
    tpu.vector_store %arg7[%c0_107, %c0_108, %c0_109], %232 {strides = array<i32>} : memref<2x8x32xf32, #tpu.memory_space<vmem>>, vector<2x8x32xf32>,
    return
  }
  func.func @transform_0(%arg0: i32) -> (i32, i32, i32) {
    %c0_i32 = arith.constant 0 : i32
    %c0_i32_0 = arith.constant 0 : i32
    %c0_i32_1 = arith.constant 0 : i32
    return %arg0, %c0_i32, %c0_i32_0 : i32, i32, i32
  }
  func.func @transform_1(%arg0: i32) -> (i32, i32, i32) {
    %c0_i32 = arith.constant 0 : i32
    %c0_i32_0 = arith.constant 0 : i32
    %c0_i32_1 = arith.constant 0 : i32
    return %arg0, %c0_i32, %c0_i32_0 : i32, i32, i32
  }
  func.func @transform_2(%arg0: i32) -> (i32, i32, i32) {
    %c0_i32 = arith.constant 0 : i32
    %c0_i32_0 = arith.constant 0 : i32
    %c0_i32_1 = arith.constant 0 : i32
    return %arg0, %c0_i32, %c0_i32_0 : i32, i32, i32
  }
  func.func @transform_3(%arg0: i32) -> (i32, i32, i32) {
    %c0_i32 = arith.constant 0 : i32
    %c0_i32_0 = arith.constant 0 : i32
    %c0_i32_1 = arith.constant 0 : i32
    %c0_i32_2 = arith.constant 0 : i32
    return %c0_i32, %c0_i32_0, %c0_i32_1 : i32, i32, i32
  }
  func.func @transform_4(%arg0: i32) -> (i32, i32) {
    %c0_i32 = arith.constant 0 : i32
    %c0_i32_0 = arith.constant 0 : i32
    %c0_i32_1 = arith.constant 0 : i32
    return %c0_i32, %c0_i32_0 : i32, i32
  }
  func.func @transform_5(%arg0: i32) -> (i32, i32, i32) {
    %c0_i32 = arith.constant 0 : i32
    %c0_i32_0 = arith.constant 0 : i32
    %c0_i32_1 = arith.constant 0 : i32
    return %arg0, %c0_i32, %c0_i32_0 : i32, i32, i32
  }
  func.func @transform_6(%arg0: i32) -> (i32, i32, i32) {
    %c0_i32 = arith.constant 0 : i32
    %c0_i32_0 = arith.constant 0 : i32
    %c0_i32_1 = arith.constant 0 : i32
    return %arg0, %c0_i32, %c0_i32_0 : i32, i32, i32
  }
}

</mosaic_0001>

<bundles_post_ra>
// kernel: tpu_custom_call.1
= control target key start
LH: loop header
LB: loop body
LE: loop exit
PB: predicated region body
PF: predicated region fallthrough
CT: control target
= control target key end

     0   :  { %12 = vsyncpa [#allocation4], 0  ;;  %s4766_s0 = inlined_call_operand.hbm [shape: f32[2,8,32], index: 0, kind: input, shape index: {}]   ;;  %s4767_s1 = inlined_call_operand.hbm [shape: f32[2,8,32], index: 1, kind: input, shape index: {}]   ;;  %s4768_s2 = inlined_call_operand.hbm [shape: f32[2,8,32], index: 2, kind: input, shape index: {}]   ;;  %s4769_s3 = inlined_call_operand.hbm [shape: f32[4,32,32], index: 3, kind: input, shape index: {}]   ;;  %s4770_s4 = inlined_call_operand.vmem [shape: f32[8,32], index: 4, kind: input, shape index: {}]   ;;  %s4771_s5 = inlined_call_operand.hbm [shape: f32[2,8,32], index: 5, kind: output, shape index: {0}]   ;;  %s4772_s6 = inlined_call_operand.hbm [shape: f32[2,8,32], index: 6, kind: output, shape index: {1}]  }
   0x1   :  { %13 = vsyncpa [#allocation7], 0 }
   0x2   :  { %14 = vsyncpa [#allocation10], 0 }
   0x3   :  { %15 = vsyncpa [#allocation5], 0 }
   0x4   :  { %16 = vsyncpa [#allocation13], 0  ;;  %s4186_s21 = smov [#allocation6]   ;;  %s4187_s23 = smov [#allocation3]  }
   0x5   :  { %s34_s22 = sshll.u32 %s4186_s21, 4  ;;  %s22_s24 = sshll.u32 %s4187_s23, 4  ;;  %s35_s22 = int_to_ptr.vmem [resolvable:$true] %s34_s22  ;;  %s4236_s24 = int_to_ptr.vmem [resolvable:$true] %s22_s24 }
   0x6   :  { %s4044_s27 = scalar_lea.hbm %s4767_s1, 256 }
   0x7   :  { %p4045_p0 = scmp.ne.s32.totalorder %s4767_s1, %s4044_s27  ;;  %p4048_p1 = scmp.lt.u32.totalorder %s4044_s27, %s4767_s1 }
   0x9   :  { %p4050_p2 = pnand %p4048_p1, %p4045_p0 }
   0xb   :  { %4053 = shalt.err (!%p4050_p2)
}
   0xc   :  { %s4054_s8 = scalar_lea.vmem %s35_s22, 256  ;;  %p4059_p4 = scmp.lt.s32.totalorder %s35_s22, %s35_s22 }
   0xd   :  { %p4055_p3 = scmp.ne.s32.totalorder %s35_s22, %s4054_s8  ;;  %p4060_p5 = scmp.lt.s32.totalorder %s4054_s8, %s4054_s8 }
   0xf   :  { %p4061_p6 = por %p4060_p5, %p4059_p4 }
  0x11   :  { %p4062_p7 = pnand %p4061_p6, %p4055_p3 }
  0x13   :  { %4065 = shalt.err (!%p4062_p7)
}
  0x14   :  { %s4188_s9 = smov 128   ;;  %s4189_s10 = smov 8  }
  0x15   :  { %40 = dma.hbm_to_vmem [thread:$0]  %s4767_s1, 256, %s35_s22, [#allocation7], %s4188_s9, %s4188_s9, %s4189_s10  }
  0x16   :  { %s4066_s15 = scalar_lea.hbm %s4766_s0, 256 }
  0x17   :  { %p4067_p8 = scmp.ne.s32.totalorder %s4766_s0, %s4066_s15  ;;  %p4070_p9 = scmp.lt.u32.totalorder %s4066_s15, %s4766_s0 }
  0x19   :  { %p4072_p10 = pnand %p4070_p9, %p4067_p8 }
  0x1b   :  { %4075 = shalt.err (!%p4072_p10)
}
  0x1c   :  { %s4076_s20 = scalar_lea.vmem %s4236_s24, 256  ;;  %p4081_p12 = scmp.lt.s32.totalorder %s4236_s24, %s4236_s24 }
  0x1d   :  { %p4077_p11 = scmp.ne.s32.totalorder %s4236_s24, %s4076_s20  ;;  %p4082_p13 = scmp.lt.s32.totalorder %s4076_s20, %s4076_s20 }
  0x1f   :  { %p4083_p0 = por %p4082_p13, %p4081_p12 }
  0x21   :  { %p4084_p1 = pnand %p4083_p0, %p4077_p11 }
  0x23   :  { %4087 = shalt.err (!%p4084_p1)
}
  0x24   :  { %28 = dma.hbm_to_vmem [thread:$0]  %s4766_s0, 256, %s4236_s24, [#allocation4], %s4188_s9, %s4188_s9, %s4189_s10  }
  0x25   :  { %s4190_s22 = smov [#allocation8]   ;;  %s4191_s25 = smov [#allocation9]  }
  0x26   :  { %s46_s23 = sshll.u32 %s4190_s22, 4  ;;  %s58_s26 = sshll.u32 %s4191_s25, 4  ;;  %s47_s23 = int_to_ptr.vmem [resolvable:$true] %s46_s23  ;;  %s4273_s26 = int_to_ptr.vmem [resolvable:$true] %s58_s26 }
  0x27   :  { %s4088_s29 = scalar_lea.hbm %s4768_s2, 256 }
  0x28   :  { %p4089_p2 = scmp.ne.s32.totalorder %s4768_s2, %s4088_s29  ;;  %p4092_p3 = scmp.lt.u32.totalorder %s4088_s29, %s4768_s2 }
  0x2a   :  { %p4094_p4 = pnand %p4092_p3, %p4089_p2 }
  0x2c   :  { %4097 = shalt.err (!%p4094_p4)
}
  0x2d   :  { %s4098_s0 = scalar_lea.vmem %s47_s23, 256  ;;  %p4103_p6 = scmp.lt.s32.totalorder %s47_s23, %s47_s23 }
  0x2e   :  { %p4099_p5 = scmp.ne.s32.totalorder %s47_s23, %s4098_s0  ;;  %p4104_p7 = scmp.lt.s32.totalorder %s4098_s0, %s4098_s0 }
  0x30   :  { %p4105_p8 = por %p4104_p7, %p4103_p6 }
  0x32   :  { %p4106_p9 = pnand %p4105_p8, %p4099_p5 }
  0x34   :  { %4109 = shalt.err (!%p4106_p9)
}
  0x35   :  { %52 = dma.hbm_to_vmem [thread:$0]  %s4768_s2, 256, %s47_s23, [#allocation7], %s4188_s9, %s4188_s9, %s4189_s10  }
  0x36   :  { %s4110_s15 = scalar_lea.hbm %s4769_s3, 2048 }
  0x37   :  { %p4111_p10 = scmp.ne.s32.totalorder %s4769_s3, %s4110_s15  ;;  %p4114_p11 = scmp.lt.u32.totalorder %s4110_s15, %s4769_s3 }
  0x39   :  { %p4116_p12 = pnand %p4114_p11, %p4111_p10 }
  0x3b   :  { %4119 = shalt.err (!%p4116_p12)
}
  0x3c   :  { %s4120_s20 = scalar_lea.vmem %s4273_s26, 2048  ;;  %p4125_p0 = scmp.lt.s32.totalorder %s4273_s26, %s4273_s26 }
  0x3d   :  { %p4121_p13 = scmp.ne.s32.totalorder %s4273_s26, %s4120_s20  ;;  %p4126_p1 = scmp.lt.s32.totalorder %s4120_s20, %s4120_s20 }
  0x3f   :  { %p4127_p2 = por %p4126_p1, %p4125_p0 }
  0x41   :  { %p4128_p3 = pnand %p4127_p2, %p4121_p13 }
  0x43   :  { %4131 = shalt.err (!%p4128_p3)
}
  0x44   :  { %64 = dma.hbm_to_vmem [thread:$0]  %s4769_s3, 2048, %s4273_s26, [#allocation10], %s4188_s9, %s4188_s9, %s4189_s10  }
  0x45   :  { %4176 = dma.done.wait [#allocation4], 256  }
  0x46   :  { %4177 = vsyncadd [#allocation4], 4294967040 }
  0x47   :  { %4178 = dma.done.wait [#allocation7], 512  }
  0x48   :  { %4179 = vsyncadd [#allocation7], 4294966784 }
  0x49   :  { %4180 = dma.done.wait [#allocation10], 2048  }
  0x4a   :  { %4181 = vsyncadd [#allocation10], 4294965248  ;;  %v84_v0 = vld [vmem:[#allocation9 + $0x20] sm:$0xff]  ;;  %v85_v1 = vld [vmem:[#allocation9 + $0x28] sm:$0xff]  ;;  %vm116_vm0 = vcmask 261120   ;;  %v4192_v16 = vmov 0.0  }
  0x4b   :  { %v79_v2 = vld [vmem:[#allocation9] sm:$0xff]  ;;  %v4310_v3 = vpack.c.bf16 %v85_v1, %v84_v0  ;;  %v80_v4 = vld [vmem:[#allocation9 + $0x8] sm:$0xff]  ;;  %v86_v5 = vld [vmem:[#allocation9 + $0x30] sm:$0xff]  ;;  %vm4193_vm1 = vmmov 0   ;;  %vm443_vm2 = vcmask 64512   ;;  %s4194_s25 = smov 120  }
  0x4c   :  { %v87_v6 = vld [vmem:[#allocation9 + $0x38] sm:$0xff]  ;;  %v3899_v7 = vpack.c.bf16 %v80_v4, %v79_v2  ;;  %v81_v9 = vld [vmem:[#allocation9 + $0x10] sm:$0xff]  ;;  %v108_v11 = vld [vmem:[#allocation6] sm:$0xff]  ;;  %s4195_s28 = smov 112   ;;  %s4196_s29 = smov 104   ;;  %vm1106_vm3 = vcmask 130112  }
  0x4d   :  { %v4312_v8 = vpack.c.bf16 %v87_v6, %v86_v5  ;;  %v82_v10 = vld [vmem:[#allocation9 + $0x18] sm:$0xff]  ;;  %3908 = vmatprep.subr.bf16.mxu1 %v4310_v3  ;;  %3681 = vmatprep.mubr.msk.f32.mxu1 %vm116_vm0, %v108_v11  ;;  %v4316_v13 = vld [vmem:[#allocation3] sm:$0xff]  ;;  %v109_v14 = vld [vmem:[#allocation6 + $0x8] sm:$0xff]  ;;  %s4197_s30 = smov 16   ;;  %vm1447_vm4 = vcmask 195712   ;;  %s4198_s7 = smov 24  }
  0x4e   :  { %v3903_v12 = vpack.c.bf16 %v82_v10, %v81_v9  ;;  %3910 = vmatpush3.bf16.msra.mxu1 %v4310_v3  ;;  %3900 = vmatprep.subr.bf16.mxu0 %v3899_v7  ;;  %v4323_v15 = vld [vmem:[#allocation3 + $0x8] sm:$0xff]  ;;  %v4336_v17 = vld [vmem:[%s4770_s4 + $0x1] ss:$0 sm:$0xff]  ;;  %v3486_v19 = vld [vmem:[%s4770_s4] ss:$0 sm:$0xff]  ;;  %vm1788_vm5 = vcmask 261312  }
  0x4f   :  { %3902 = vmatpush3.bf16.msra.mxu0 %v3899_v7  ;;  %3912 = vmatprep.subr.bf16.mxu1 %v4312_v8  ;;  %v89_v31 = vld [vmem:[#allocation9 + $0x40] sm:$0xff]  ;;  %v90_v32 = vld [vmem:[#allocation9 + $0x48] sm:$0xff]  ;;  %v91_v33 = vld [vmem:[#allocation9 + $0x50] sm:$0xff]  ;;  %s4199_s14 = smov [#allocation11]  }
  0x50   :  { %3904 = vmatprep.subr.bf16.mxu0 %v3903_v12  ;;  %3670 = vmatprep.mubr.msk.f32.mxu0 %vm116_vm0, %v4316_v13  ;;  %v3915_v34 = vpack.c.bf16 %v90_v32, %v89_v31  ;;  %v92_v35 = vld [vmem:[#allocation9 + $0x58] sm:$0xff]  ;;  %v110_v36 = vld [vmem:[#allocation8] sm:$0xff]  ;;  %v3492_v56 = vld [vmem:[%s4770_s4 + $0x2] ss:$0 sm:$0xff]  ;;  %s3456_s15 = sshll.u32 %s4199_s14, 4  ;;  %s3457_s15 = int_to_ptr.vmem [resolvable:$true] %s3456_s15 }
  0x51   :  { %v3919_v37 = vpack.c.bf16 %v92_v35, %v91_v33  ;;  %v111_v38 = vld [vmem:[#allocation8 + $0x8] sm:$0xff]  ;;  %s4132_s16 = scalar_lea.vmem %s3457_s15, 256  ;;  %p4137_p5 = scmp.lt.s32.totalorder %s3457_s15, %s3457_s15 }
  0x52   :  { %3914 = vmatpush3.bf16.msra.mxu1 %v4312_v8  ;;  %p4133_p4 = scmp.ne.s32.totalorder %s3457_s15, %s4132_s16  ;;  %p4138_p6 = scmp.lt.s32.totalorder %s4132_s16, %s4132_s16 }
  0x53   :  { %3906 = vmatpush3.bf16.msra.mxu0 %v3903_v12  ;;  %3924 = vmatprep.subr.bf16.mxu1 %v3899_v7 }
  0x54   :  { %3916 = vmatprep.subr.bf16.mxu0 %v3915_v34  ;;  %p4139_p7 = por %p4138_p6, %p4137_p5 }
  0x55   :  { %3682 = vmatmul.mubr.msk.f32.vlgmr.msra.gmra.mrb[0].mxu1 %vm116_vm0, %v109_v14 }
  0x56   :  { %3671 = vmatmul.mubr.msk.f32.vlgmr.msra.gmra.mrb[0].mxu0 %vm116_vm0, %v4323_v15  ;;  %3926 = vmatpush3.bf16.msra.mxu1 %v3899_v7  ;;  %p4140_p8 = pnand %p4139_p7, %p4133_p4 }
  0x57   :  { %3928 = vmatprep.subr.bf16.mxu1 %v3903_v12  ;;  %3703 = vmatprep.mubr.msk.f32.mxu1 %vm116_vm0, %v108_v11 }
  0x58   :  { %3692 = vmatprep.mubr.msk.f32.mxu0 %vm116_vm0, %v110_v36  ;;  %3918 = vmatpush3.bf16.msra.mxu0 %v3915_v34 }
  0x59   :  { %3920 = vmatprep.subr.bf16.mxu0 %v3919_v37 }
  0x5a   :  { %3930 = vmatpush3.bf16.msra.mxu1 %v3903_v12 }
  0x5b   :  { %3706 = vmatprep.subr.mxu1 %v4192_v16 }
  0x5c   :  { %3922 = vmatpush3.bf16.msra.mxu0 %v3919_v37 }
  0x5d   :  { %3704 = vmatmul.mubr.msk.f32.vlgmr.msra.gmra.mrb[2].mxu1 %vm116_vm0, %v109_v14  ;;  %3716 = vmatprep.subr.mxu0 %v4192_v16 }
  0x5e   :  { %3708 = vmatprep.mubr.msk.f32.mxu1 %vm4193_vm1, %v4192_v16 }
  0x5f   :  { %3693 = vmatmul.mubr.msk.f32.vlgmr.msra.gmra.mrb[2].mxu0 %vm116_vm0, %v111_v38 }
  0x60   :  { %3718 = vmatprep.mubr.msk.f32.mxu0 %vm4193_vm1, %v4192_v16 }
 0x128   :  { %v3683_v18 = vpop.f32.mrb[0].mxu1 }
 0x129   :  { %v4342_v20 = vadd.f32 %v3683_v18, %v4336_v17  ;;  %v274_v21 = vpop.f32.mrb[1].mxu1  ;;  %v3672_v22 = vpop.f32.mrb[0].mxu0 }
 0x12a   :  { %v4345_v23 = vadd.f32 %v4336_v17, %v274_v21  ;;  %v189_v24 = vpop.f32.mrb[1].mxu0  ;;  %v4362_v27 = vadd.f32 %v3672_v22, %v3486_v19 }
 0x12b   :  { %846 = vrot.lane.b32.xlu1 %v4342_v20, %s4194_s25  ;;  %v4349_v25 = vadd.f32 %v3486_v19, %v189_v24 }
 0x12c   :  { %3707 = vmatpush3.xpose.msk.msra.mxu1 %vm443_vm2, %v4345_v23 }
 0x12d   :  { %3711 = vmatprep.subr.mxu1 %v4192_v16 }
 0x12f   :  { %766 = vrot.lane.b32.xlu1 %v4349_v25, %s4194_s25  ;;  %3709 = vmatmul.mubr.msk.f32.vlgmr.msra.gmra.mrb[4].mxu1 %vm443_vm2, %v4349_v25 }
 0x130   :  { %3712 = vmatpush3.xpose.msk.msra.mxu1 %vm443_vm2, %v4342_v20  ;;  %3713 = vmatprep.mubr.msk.f32.mxu1 %vm4193_vm1, %v4192_v16  ;;  %v3705_v26 = vpop.f32.mrb[2].mxu1 }
 0x131   :  { %v4364_v28 = vadd.f32 %v3705_v26, %v3486_v19  ;;  %v434_v29 = vpop.f32.mrb[3].mxu1  ;;  %3721 = vmatprep.subr.mxu1 %v4192_v16 }
 0x132   :  { %v4367_v30 = vadd.f32 %v3486_v19, %v434_v29  ;;  %v3694_v55 = vpop.f32.mrb[2].mxu0 }
 0x133   :  { %3714 = vmatmul.mubr.msk.f32.vlgmr.msra.gmra.mrb[6].mxu1 %vm443_vm2, %v4362_v27  ;;  %v359_v57 = vpop.f32.mrb[3].mxu0  ;;  %v4387_v58 = vadd.f32 %v3694_v55, %v3492_v56 }
 0x134   :  { %3723 = vmatprep.mubr.msk.f32.mxu1 %vm4193_vm1, %v4192_v16  ;;  %v4389_v59 = vadd.f32 %v3492_v56, %v359_v57 }
 0x135   :  { %3722 = vmatpush3.msra.mxu1 %v4387_v58 }
 0x136   :  { %3717 = vmatpush3.msra.mxu0 %v4389_v59  ;;  %3731 = vmatprep.subr.mxu1 %v4192_v16 }
 0x137   :  { %3726 = vmatprep.subr.mxu0 %v4192_v16 }
 0x19d   :  { %v847_v60 = vpop.permute.xlu1 %846 }
 0x1a1   :  { %v767_v61 = vpop.permute.xlu1 %766 }
 0x202   :  { %v516_v39 = vpop.f32.mrb[4].mxu1 }
 0x203   :  { %v3710_v40 = vpop.f32.mrb[5].mxu1  ;;  %v596_v41 = vsel %vm443_vm2, %v516_v39, -inf }
 0x204   :  { %597 = vmax.xlane.f32.xlu0 %v596_v41 }
 0x206   :  { %v592_v42 = vpop.f32.mrb[6].mxu1 }
 0x207   :  { %v3715_v43 = vpop.f32.mrb[7].mxu1  ;;  %v599_v44 = vsel %vm443_vm2, %v592_v42, -inf }
 0x208   :  { %600 = vmax.xlane.f32.xlu0 %v599_v44 }
 0x21e   :  { %768 = vrot.lane.b32.xlu0 %v4345_v23, %s4194_s25 }
 0x291   :  { %v598_v45 = vpop.xlane.xlu0 %597 }
 0x292   :  { %v602_v46 = vsub.f32 %v516_v39, %v598_v45 }
 0x294   :  { %v604_v47 = vmul.f32 1.442695, %v602_v46 }
 0x295   :  { %v601_v48 = vpop.xlane.xlu0 %600 }
 0x296   :  { %3970 = vpow2.f32 %v604_v47  ;;  %v603_v49 = vsub.f32 %v592_v42, %v601_v48 }
 0x298   :  { %v606_v50 = vmul.f32 1.442695, %v603_v49 }
 0x299   :  { %v769_v2 = vpop.permute.xlu0 %768 }
 0x29a   :  { %3972 = vpow2.f32 %v606_v50 }
 0x2a0   :  { %v3971_v51 = vpop.eup %3970 }
 0x2a1   :  { %v608_v52 = vsel %vm443_vm2, %v3971_v51, 0.0 }
 0x2a2   :  { %609 = vadd.xlane.f32.xlu1 %v608_v52 }
 0x2a4   :  { %v3973_v53 = vpop.eup %3972 }
 0x2a5   :  { %v611_v54 = vsel %vm443_vm2, %v3973_v53, 0.0 }
 0x2a6   :  { %612 = vadd.xlane.f32.xlu1 %v611_v54 }
 0x2b7   :  { %844 = vrot.lane.b32.xlu1 %v4362_v27, %s4194_s25 }
 0x32f   :  { %v610_v62 = vpop.xlane.xlu1 %609 }
 0x330   :  { %3974 = vrcp.f32 %v610_v62 }
 0x333   :  { %v613_v63 = vpop.xlane.xlu1 %612 }
 0x334   :  { %3976 = vrcp.f32 %v613_v63 }
 0x337   :  { %v845_v6 = vpop.permute.xlu1 %844 }
 0x33a   :  { %v3975_v0 = vpop.eup %3974 }
 0x33b   :  { %v616_v1 = vmul.f32 %v3975_v0, %v3971_v51 }
 0x33d   :  { %3719 = vmatmul.mubr.msk.f32.vlgmr.msra.gmra.mrb[4].mxu0 %vm443_vm2, %v616_v1 }
 0x33e   :  { %v3977_v4 = vpop.eup %3976  ;;  %3727 = vmatpush3.xpose.msk.msra.mxu0 %vm443_vm2, %v769_v2  ;;  %3728 = vmatprep.mubr.msk.f32.mxu0 %vm4193_vm1, %v4192_v16 }
 0x33f   :  { %v617_v5 = vmul.f32 %v3977_v4, %v3973_v53  ;;  %3736 = vmatprep.subr.mxu0 %v4192_v16 }
 0x341   :  { %3724 = vmatmul.mubr.msk.f32.vlgmr.msra.gmra.mrb[8].mxu1 %vm443_vm2, %v617_v5  ;;  %3729 = vmatmul.mubr.msk.f32.vlgmr.msra.gmra.mrb[6].mxu0 %vm443_vm2, %v767_v61 }
 0x342   :  { %3732 = vmatpush3.xpose.msk.msra.mxu1 %vm443_vm2, %v847_v60  ;;  %3733 = vmatprep.mubr.msk.f32.mxu1 %vm4193_vm1, %v4192_v16 }
 0x343   :  { %3741 = vmatprep.subr.mxu1 %v4192_v16  ;;  %3738 = vmatprep.mubr.msk.f32.mxu0 %vm4193_vm1, %v4192_v16 }
 0x345   :  { %3734 = vmatmul.mubr.msk.f32.vlgmr.msra.gmra.mrb[10].mxu1 %vm443_vm2, %v845_v6 }
 0x346   :  { %3743 = vmatprep.mubr.msk.f32.mxu1 %vm4193_vm1, %v4192_v16 }
 0x410   :  { %v687_v7 = vpop.f32.mrb[4].mxu0 }
 0x411   :  { %764 = vst.msk [vmem:[#allocation2] sm:$0xff] %vm443_vm2, %v687_v7  ;;  %v3720_v9 = vpop.f32.mrb[5].mxu0 }
 0x414   :  { %v760_v10 = vpop.f32.mrb[8].mxu1  ;;  %v840_v11 = vpop.f32.mrb[6].mxu0 }
 0x415   :  { %765 = vst.msk [vmem:[#allocation2 + $0x8] sm:$0xff] %vm443_vm2, %v760_v10  ;;  %v3725_v12 = vpop.f32.mrb[9].mxu1  ;;  %v3730_v14 = vpop.f32.mrb[7].mxu0  ;;  %v922_v18 = vsel %vm443_vm2, %v840_v11, -inf }
 0x416   :  { %923 = vmax.xlane.f32.xlu0 %v922_v18 }
 0x418   :  { %v918_v19 = vpop.f32.mrb[10].mxu1 }
 0x419   :  { %v3735_v21 = vpop.f32.mrb[11].mxu1  ;;  %v925_v22 = vsel %vm443_vm2, %v918_v19, -inf }
 0x41a   :  { %926 = vmax.xlane.f32.xlu1 %v925_v22 }
 0x42b   :  { %1022 = vrot.lane.b32.xlu1 %v4387_v58, %s4194_s25 }
 0x42c   :  { %945 = vrot.lane.b32.xlu0 %v4389_v59, %s4194_s25 }
 0x42f   :  { %1111 = vrot.lane.b32.xlu1 %v4345_v23, %s4195_s28 }
 0x433   :  { %1189 = vrot.lane.b32.xlu1 %v4342_v20, %s4195_s28 }
 0x437   :  { %1187 = vrot.lane.b32.xlu1 %v4362_v27, %s4195_s28 }
 0x4a3   :  { %v924_v24 = vpop.xlane.xlu0 %923 }
 0x4a4   :  { %v928_v26 = vsub.f32 %v840_v11, %v924_v24 }
 0x4a6   :  { %v930_v29 = vmul.f32 1.442695, %v928_v26 }
 0x4a7   :  { %v4427_v31 = vpop.permute.xlu0 %945  ;;  %v927_v32 = vpop.xlane.xlu1 %926 }
 0x4a8   :  { %3978 = vpow2.f32 %v930_v29  ;;  %v929_v33 = vsub.f32 %v918_v19, %v927_v32  ;;  %3737 = vmatpush3.msra.mxu0 %v4427_v31 }
 0x4a9   :  { %3746 = vmatprep.subr.mxu0 %v4192_v16 }
 0x4aa   :  { %v932_v34 = vmul.f32 1.442695, %v929_v33 }
 0x4ab   :  { %v4431_v35 = vpop.permute.xlu1 %1022 }
 0x4ac   :  { %3980 = vpow2.f32 %v932_v34  ;;  %3742 = vmatpush3.msra.mxu1 %v4431_v35 }
 0x4ad   :  { %3751 = vmatprep.subr.mxu1 %v4192_v16 }
 0x4af   :  { %v1112_v42 = vpop.permute.xlu1 %1111 }
 0x4b2   :  { %v3979_v36 = vpop.eup %3978 }
 0x4b3   :  { %v934_v37 = vsel %vm443_vm2, %v3979_v36, 0.0  ;;  %v1190_v46 = vpop.permute.xlu1 %1189 }
 0x4b4   :  { %935 = vadd.xlane.f32.xlu0 %v934_v37 }
 0x4b6   :  { %v3981_v38 = vpop.eup %3980 }
 0x4b7   :  { %v937_v39 = vsel %vm443_vm2, %v3981_v38, 0.0  ;;  %v1188_v49 = vpop.permute.xlu1 %1187 }
 0x4b8   :  { %938 = vadd.xlane.f32.xlu0 %v937_v39 }
 0x4ce   :  { %1109 = vrot.lane.b32.xlu0 %v4349_v25, %s4195_s28 }
 0x541   :  { %v936_v40 = vpop.xlane.xlu0 %935 }
 0x542   :  { %3982 = vrcp.f32 %v936_v40 }
 0x545   :  { %v939_v41 = vpop.xlane.xlu0 %938 }
 0x546   :  { %3984 = vrcp.f32 %v939_v41 }
 0x549   :  { %v1110_v48 = vpop.permute.xlu0 %1109 }
 0x54c   :  { %v3983_v43 = vpop.eup %3982 }
 0x54d   :  { %v942_v44 = vmul.f32 %v3983_v43, %v3979_v36 }
 0x54f   :  { %3739 = vmatmul.mubr.msk.f32.vlgmr.msra.gmra.mrb[8].mxu0 %vm443_vm2, %v942_v44 }
 0x550   :  { %v3985_v45 = vpop.eup %3984  ;;  %3747 = vmatpush3.xpose.msk.msra.mxu0 %vm443_vm2, %v1112_v42  ;;  %3748 = vmatprep.mubr.msk.f32.mxu0 %vm4193_vm1, %v4192_v16 }
 0x551   :  { %v943_v47 = vmul.f32 %v3985_v45, %v3981_v38  ;;  %3756 = vmatprep.subr.mxu0 %v4192_v16 }
 0x553   :  { %3744 = vmatmul.mubr.msk.f32.vlgmr.msra.gmra.mrb[12].mxu1 %vm443_vm2, %v943_v47  ;;  %3749 = vmatmul.mubr.msk.f32.vlgmr.msra.gmra.mrb[10].mxu0 %vm443_vm2, %v1110_v48 }
 0x554   :  { %3752 = vmatpush3.xpose.msk.msra.mxu1 %vm443_vm2, %v1190_v46  ;;  %3753 = vmatprep.mubr.msk.f32.mxu1 %vm4193_vm1, %v4192_v16 }
 0x555   :  { %3761 = vmatprep.subr.mxu1 %v4192_v16  ;;  %3758 = vmatprep.mubr.msk.f32.mxu0 %vm4193_vm1, %v4192_v16 }
 0x557   :  { %3754 = vmatmul.mubr.msk.f32.vlgmr.msra.gmra.mrb[14].mxu1 %vm443_vm2, %v1188_v49 }
 0x558   :  { %3763 = vmatprep.mubr.msk.f32.mxu1 %vm4193_vm1, %v4192_v16 }
 0x622   :  { %v4455_v50 = vpop.f32.mrb[8].mxu0 }
 0x623   :  { %v3740_v51 = vpop.f32.mrb[9].mxu0 }
 0x626   :  { %v4457_v52 = vpop.f32.mrb[12].mxu1  ;;  %v1183_v53 = vpop.f32.mrb[10].mxu0 }
 0x627   :  { %v3745_v54 = vpop.f32.mrb[13].mxu1  ;;  %v3750_v55 = vpop.f32.mrb[11].mxu0  ;;  %v1265_v56 = vsel %vm443_vm2, %v1183_v53, -inf }
 0x628   :  { %1266 = vmax.xlane.f32.xlu0 %v1265_v56 }
 0x62a   :  { %v1261_v57 = vpop.f32.mrb[14].mxu1 }
 0x62b   :  { %v3755_v60 = vpop.f32.mrb[15].mxu1  ;;  %v1268_v61 = vsel %vm443_vm2, %v1261_v57, -inf }
 0x62c   :  { %1269 = vmax.xlane.f32.xlu1 %v1268_v61 }
 0x63d   :  { %1363 = vrot.lane.b32.xlu1 %v4387_v58, %s4195_s28 }
 0x63e   :  { %1287 = vrot.lane.b32.xlu0 %v4389_v59, %s4195_s28 }
 0x641   :  { %1452 = vrot.lane.b32.xlu1 %v4345_v23, %s4196_s29 }
 0x645   :  { %1530 = vrot.lane.b32.xlu1 %v4342_v20, %s4196_s29 }
 0x649   :  { %1528 = vrot.lane.b32.xlu1 %v4362_v27, %s4196_s29 }
 0x6b5   :  { %v1267_v62 = vpop.xlane.xlu0 %1266 }
 0x6b6   :  { %v1271_v63 = vsub.f32 %v1183_v53, %v1267_v62 }
 0x6b8   :  { %v1273_v0 = vmul.f32 1.442695, %v1271_v63 }
 0x6b9   :  { %v4471_v1 = vpop.permute.xlu0 %1287  ;;  %v1270_v2 = vpop.xlane.xlu1 %1269 }
 0x6ba   :  { %3986 = vpow2.f32 %v1273_v0  ;;  %v1272_v4 = vsub.f32 %v1261_v57, %v1270_v2  ;;  %3757 = vmatpush3.msra.mxu0 %v4471_v1  ;;  %v94_v0 = vld [vmem:[#allocation9 + $0x60] sm:$0xff]  ;;  %v95_v2 = vld [vmem:[#allocation9 + $0x68] sm:$0xff] }
 0x6bb   :  { %3766 = vmatprep.subr.mxu0 %v4192_v16 }
 0x6bc   :  { %v1275_v5 = vmul.f32 1.442695, %v1272_v4  ;;  %v4530_v4 = vpack.c.bf16 %v95_v2, %v94_v0 }
 0x6bd   :  { %v4475_v23 = vpop.permute.xlu1 %1363 }
 0x6be   :  { %3988 = vpow2.f32 %v1275_v5  ;;  %3762 = vmatpush3.msra.mxu1 %v4475_v23  ;;  %v96_v5 = vld [vmem:[#allocation9 + $0x70] sm:$0xff] }
 0x6bf   :  { %3771 = vmatprep.subr.mxu1 %v4192_v16 }
 0x6c1   :  { %v1453_v11 = vpop.permute.xlu1 %1452 }
 0x6c4   :  { %v3987_v20 = vpop.eup %3986 }
 0x6c5   :  { %v1277_v27 = vsel %vm443_vm2, %v3987_v20, 0.0  ;;  %v1531_v19 = vpop.permute.xlu1 %1530 }
 0x6c6   :  { %1278 = vadd.xlane.f32.xlu0 %v1277_v27 }
 0x6c8   :  { %v3989_v6 = vpop.eup %3988 }
 0x6c9   :  { %v1280_v7 = vsel %vm443_vm2, %v3989_v6, 0.0  ;;  %v1529_v22 = vpop.permute.xlu1 %1528 }
 0x6ca   :  { %1281 = vadd.xlane.f32.xlu0 %v1280_v7 }
 0x6e0   :  { %1450 = vrot.lane.b32.xlu0 %v4349_v25, %s4196_s29 }
 0x753   :  { %v1279_v9 = vpop.xlane.xlu0 %1278 }
 0x754   :  { %3990 = vrcp.f32 %v1279_v9 }
 0x757   :  { %v1282_v10 = vpop.xlane.xlu0 %1281 }
 0x758   :  { %3992 = vrcp.f32 %v1282_v10 }
 0x75b   :  { %v1451_v25 = vpop.permute.xlu0 %1450 }
 0x75e   :  { %v3991_v12 = vpop.eup %3990 }
 0x75f   :  { %v1285_v14 = vmul.f32 %v3991_v12, %v3987_v20  ;;  %v97_v20 = vld [vmem:[#allocation9 + $0x78] sm:$0xff] }
 0x760   :  { %v4533_v27 = vpack.c.bf16 %v97_v20, %v96_v5 }
 0x761   :  { %3759 = vmatmul.mubr.msk.f32.vlgmr.msra.gmra.mrb[12].mxu0 %vm443_vm2, %v1285_v14  ;;  %v4550_v14 = vld [vmem:[%s4770_s4 + $0x3] ss:$0 sm:$0xff] }
 0x762   :  { %v3993_v18 = vpop.eup %3992  ;;  %3767 = vmatpush3.xpose.msk.msra.mxu0 %vm443_vm2, %v1453_v11  ;;  %3768 = vmatprep.mubr.msk.f32.mxu0 %vm4193_vm1, %v4192_v16 }
 0x763   :  { %v1286_v21 = vmul.f32 %v3993_v18, %v3989_v6  ;;  %3776 = vmatprep.subr.mxu0 %v4192_v16 }
 0x765   :  { %3764 = vmatmul.mubr.msk.f32.vlgmr.msra.gmra.mrb[16].mxu1 %vm443_vm2, %v1286_v21  ;;  %3769 = vmatmul.mubr.msk.f32.vlgmr.msra.gmra.mrb[14].mxu0 %vm443_vm2, %v1451_v25 }
 0x766   :  { %3772 = vmatpush3.xpose.msk.msra.mxu1 %vm443_vm2, %v1531_v19  ;;  %3773 = vmatprep.mubr.msk.f32.mxu1 %vm4193_vm1, %v4192_v16 }
 0x767   :  { %3781 = vmatprep.subr.mxu1 %v4192_v16  ;;  %3778 = vmatprep.mubr.msk.f32.mxu0 %vm4193_vm1, %v4192_v16 }
 0x769   :  { %3774 = vmatmul.mubr.msk.f32.vlgmr.msra.gmra.mrb[18].mxu1 %vm443_vm2, %v1529_v22 }
 0x76a   :  { %3783 = vmatprep.mubr.msk.f32.mxu1 %vm4193_vm1, %v4192_v16 }
 0x834   :  { %v1359_v24 = vpop.f32.mrb[12].mxu0 }
 0x835   :  { %v3760_v26 = vpop.f32.mrb[13].mxu0 }
 0x838   :  { %v1435_v29 = vpop.f32.mrb[16].mxu1  ;;  %v1524_v32 = vpop.f32.mrb[14].mxu0 }
 0x839   :  { %v3765_v33 = vpop.f32.mrb[17].mxu1  ;;  %v3770_v34 = vpop.f32.mrb[15].mxu0  ;;  %v1606_v36 = vsel %vm443_vm2, %v1524_v32, -inf }
 0x83a   :  { %1607 = vmax.xlane.f32.xlu0 %v1606_v36 }
 0x83c   :  { %v1602_v37 = vpop.f32.mrb[18].mxu1 }
 0x83d   :  { %v3775_v38 = vpop.f32.mrb[19].mxu1  ;;  %v1609_v39 = vsel %vm443_vm2, %v1602_v37, -inf }
 0x83e   :  { %1610 = vmax.xlane.f32.xlu1 %v1609_v39 }
 0x84f   :  { %1704 = vrot.lane.b32.xlu1 %v4387_v58, %s4196_s29 }
 0x853   :  { %1100 = vrot.lane.b32.xlu1 %v4455_v50, %s4189_s10 }
 0x857   :  { %1102 = vrot.lane.b32.xlu1 %v4457_v52, %s4189_s10 }
 0x85b   :  { %1443 = vrot.lane.b32.xlu1 %v1435_v29, %s4197_s30 }
 0x8c7   :  { %v1608_v40 = vpop.xlane.xlu0 %1607 }
 0x8c8   :  { %v1612_v41 = vsub.f32 %v1524_v32, %v1608_v40 }
 0x8ca   :  { %v1614_v42 = vmul.f32 1.442695, %v1612_v41 }
 0x8cb   :  { %v1611_v43 = vpop.xlane.xlu1 %1610 }
 0x8cc   :  { %3994 = vpow2.f32 %v1614_v42  ;;  %v1613_v44 = vsub.f32 %v1602_v37, %v1611_v43 }
 0x8ce   :  { %v1616_v45 = vmul.f32 1.442695, %v1613_v44 }
 0x8cf   :  { %v4508_v46 = vpop.permute.xlu1 %1704 }
 0x8d0   :  { %3996 = vpow2.f32 %v1616_v45  ;;  %3782 = vmatpush3.msra.mxu1 %v4508_v46 }
 0x8d1   :  { %3940 = vmatprep.subr.bf16.mxu1 %v4310_v3 }
 0x8d3   :  { %v1101_v47 = vpop.permute.xlu1 %1100 }
 0x8d4   :  { %1107 = vst.msk [vmem:[#allocation2] sm:$0xff] %vm1106_vm3, %v1101_v47 }
 0x8d6   :  { %v3995_v48 = vpop.eup %3994 }
 0x8d7   :  { %v1103_v49 = vpop.permute.xlu1 %1102  ;;  %v1618_v50 = vsel %vm443_vm2, %v3995_v48, 0.0 }
 0x8d8   :  { %1108 = vst.msk [vmem:[#allocation2 + $0x8] sm:$0xff] %vm1106_vm3, %v1103_v49  ;;  %1619 = vadd.xlane.f32.xlu0 %v1618_v50  ;;  %v3524_v49 = vld [vmem:[%s4770_s4 + $0x4] ss:$0 sm:$0xff] }
 0x8da   :  { %v3997_v51 = vpop.eup %3996 }
 0x8db   :  { %v1444_v52 = vpop.permute.xlu1 %1443  ;;  %v1621_v53 = vsel %vm443_vm2, %v3997_v51, 0.0 }
 0x8dc   :  { %1449 = vst.msk [vmem:[#allocation2 + $0x8] sm:$0xff] %vm1447_vm4, %v1444_v52  ;;  %1622 = vadd.xlane.f32.xlu0 %v1621_v53 }
 0x8f2   :  { %1628 = vrot.lane.b32.xlu0 %v4389_v59, %s4196_s29 }
 0x8f6   :  { %1441 = vrot.lane.b32.xlu0 %v1359_v24, %s4197_s30 }
 0x965   :  { %v1620_v54 = vpop.xlane.xlu0 %1619 }
 0x966   :  { %3998 = vrcp.f32 %v1620_v54 }
 0x969   :  { %v1623_v55 = vpop.xlane.xlu0 %1622 }
 0x96a   :  { %4000 = vrcp.f32 %v1623_v55 }
 0x96d   :  { %v4520_v56 = vpop.permute.xlu0 %1628 }
 0x96e   :  { %3777 = vmatpush3.msra.mxu0 %v4520_v56 }
 0x96f   :  { %3932 = vmatprep.subr.bf16.mxu0 %v4530_v4 }
 0x970   :  { %v3999_v57 = vpop.eup %3998 }
 0x971   :  { %v1626_v60 = vmul.f32 %v3999_v57, %v3995_v48  ;;  %v1442_v61 = vpop.permute.xlu0 %1441 }
 0x972   :  { %1448 = vst.msk [vmem:[#allocation2] sm:$0xff] %vm1447_vm4, %v1442_v61 }
 0x973   :  { %3779 = vmatmul.mubr.msk.f32.vlgmr.msra.gmra.mrb[16].mxu0 %vm443_vm2, %v1626_v60 }
 0x974   :  { %v4001_v62 = vpop.eup %4000  ;;  %3934 = vmatpush3.bf16.msra.mxu0 %v4530_v4 }
 0x975   :  { %v1627_v63 = vmul.f32 %v4001_v62, %v3997_v51  ;;  %3936 = vmatprep.subr.bf16.mxu0 %v4533_v27  ;;  %v3525_v51 = vld [vmem:[%s4770_s4 + $0x5] ss:$0 sm:$0xff] }
 0x977   :  { %3784 = vmatmul.mubr.msk.f32.vlgmr.msra.gmra.mrb[20].mxu1 %vm443_vm2, %v1627_v63 }
 0x978   :  { %3942 = vmatpush3.bf16.msra.mxu1 %v4310_v3  ;;  %3938 = vmatpush3.bf16.msra.mxu0 %v4533_v27 }
 0x979   :  { %3944 = vmatprep.subr.bf16.mxu1 %v4312_v8  ;;  %3808 = vmatprep.subr.mxu0 %v4192_v16 }
 0x97c   :  { %3946 = vmatpush3.bf16.msra.mxu1 %v4312_v8 }
 0x97d   :  { %3813 = vmatprep.subr.mxu1 %v4192_v16 }
 0xa46   :  { %v1700_v3 = vpop.f32.mrb[16].mxu0 }
 0xa47   :  { %1782 = vrot.lane.b32.xlu0 %v1700_v3, %s4198_s7  ;;  %v3780_v8 = vpop.f32.mrb[17].mxu0 }
 0xa4a   :  { %v1776_v6 = vpop.f32.mrb[20].mxu1 }
 0xa4b   :  { %1784 = vrot.lane.b32.xlu1 %v1776_v6, %s4198_s7  ;;  %v3785_v7 = vpop.f32.mrb[21].mxu1 }
 0xab9   :  { %v1783_v9 = vpop.permute.xlu0 %1782 }
 0xaba   :  { %1789 = vst.msk [vmem:[#allocation2] sm:$0xff] %vm1788_vm5, %v1783_v9 }
 0xabd   :  { %v1785_v10 = vpop.permute.xlu1 %1784 }
 0xabe   :  { %1790 = vst.msk [vmem:[#allocation2 + $0x8] sm:$0xff] %vm1788_vm5, %v1785_v10 }
 0xac1   :  { %v1791_v11 = vld [vmem:[#allocation2] sm:$0xff] }
 0xac2   :  { %3794 = vmatprep.mubr.msk.f32.mxu0 %vm116_vm0, %v1791_v11 }
 0xac5   :  { %v1792_v12 = vld [vmem:[#allocation2 + $0x8] sm:$0xff] }
 0xac6   :  { %3795 = vmatmul.mubr.msk.f32.vlgmr.msra.gmra.mrb[18].mxu0 %vm116_vm0, %v1792_v12 }
 0xac7   :  { %3810 = vmatprep.mubr.msk.f32.mxu0 %vm4193_vm1, %v4192_v16 }
 0xb99   :  { %v3796_v18 = vpop.f32.mrb[18].mxu0 }
 0xb9a   :  { %v1875_v19 = vadd.f32 %v3796_v18, %v4550_v14  ;;  %v1869_v21 = vpop.f32.mrb[19].mxu0 }
 0xb9b   :  { %v1870_v25 = vadd.f32 %v4550_v14, %v1869_v21 }
 0xb9c   :  { %v1879_v22 = vadd.f32 %v1875_v19, %v4323_v15 }
 0xb9d   :  { %v1878_v24 = vadd.f32 %v1870_v25, %v4316_v13 }
 0xb9e   :  { %v1883_v26 = vsel %vm116_vm0, %v1879_v22, 0.0 }
 0xb9f   :  { %1884 = vadd.xlane.f32.xlu1 %v1883_v26  ;;  %v1880_v29 = vsel %vm116_vm0, %v1878_v24, 0.0 }
 0xba0   :  { %1881 = vadd.xlane.f32.xlu0 %v1880_v29 }
 0xc2c   :  { %v1885_v32 = vpop.xlane.xlu1 %1884 }
 0xc2d   :  { %v1888_v33 = vmul.f32 0.03125, %v1885_v32  ;;  %v1882_v34 = vpop.xlane.xlu0 %1881 }
 0xc2e   :  { %v1887_v36 = vmul.f32 0.03125, %v1882_v34 }
 0xc2f   :  { %v1890_v37 = vsub.f32 %v1879_v22, %v1888_v33 }
 0xc30   :  { %v1889_v38 = vsub.f32 %v1878_v24, %v1887_v36 }
 0xc31   :  { %v1892_v41 = vmul.f32 %v1890_v37, %v1890_v37 }
 0xc32   :  { %v1891_v39 = vmul.f32 %v1889_v38, %v1889_v38 }
 0xc33   :  { %v1896_v15 = vsel %vm116_vm0, %v1892_v41, 0.0 }
 0xc34   :  { %v1893_v40 = vsel %vm116_vm0, %v1891_v39, 0.0 }
 0xc35   :  { %1894 = vadd.xlane.f32.xlu0 %v1893_v40 }
 0xc39   :  { %1897 = vadd.xlane.f32.xlu0 %v1896_v15 }
 0xcc2   :  { %v1895_v13 = vpop.xlane.xlu0 %1894 }
 0xcc3   :  { %v1899_v42 = vmul.f32 0.03125, %v1895_v13 }
 0xcc5   :  { %v1901_v43 = vadd.f32 1e-05, %v1899_v42 }
 0xcc6   :  { %v1898_v44 = vpop.xlane.xlu0 %1897 }
 0xcc7   :  { %4002 = vrsqrt.f32 %v1901_v43  ;;  %v1900_v45 = vmul.f32 0.03125, %v1898_v44 }
 0xcc9   :  { %v1902_v47 = vadd.f32 1e-05, %v1900_v45 }
 0xccb   :  { %4004 = vrsqrt.f32 %v1902_v47 }
 0xcd1   :  { %v4003_v48 = vpop.eup %4002 }
 0xcd2   :  { %v1905_v50 = vmul.f32 %v4003_v48, %v1889_v38 }
 0xcd4   :  { %v1911_v52 = vmul.f32 %v3524_v49, %v1905_v50 }
 0xcd5   :  { %v4005_v53 = vpop.eup %4004 }
 0xcd6   :  { %v1906_v54 = vmul.f32 %v4005_v53, %v1890_v37  ;;  %v1917_v55 = vadd.f32 %v3525_v51, %v1911_v52 }
 0xcd8   :  { %v1912_v57 = vmul.f32 %v3524_v49, %v1906_v54  ;;  %3805 = vmatprep.mubr.msk.f32.mxu1 %vm116_vm0, %v1917_v55  ;;  %3447 = vst.msk [vmem:[#allocation11] sm:$0xff] %vm116_vm0, %v1917_v55 }
 0xcda   :  { %v1918_v60 = vadd.f32 %v3525_v51, %v1912_v57 }
 0xcdc   :  { %3448 = vst.msk [vmem:[#allocation11 + $0x8] sm:$0xff] %vm116_vm0, %v1918_v60  ;;  %3806 = vmatmul.mubr.msk.f32.vlgmr.msra.gmra.mrb[22].mxu1 %vm116_vm0, %v1918_v60 }
 0xcdd   :  { %3815 = vmatprep.mubr.msk.f32.mxu1 %vm4193_vm1, %v4192_v16 }
 0xdaf   :  { %v3807_v61 = vpop.f32.mrb[22].mxu1 }
 0xdb0   :  { %v4573_v62 = vadd.f32 %v3807_v61, %v4336_v17  ;;  %v1991_v63 = vpop.f32.mrb[23].mxu1 }
 0xdb1   :  { %v4576_v0 = vadd.f32 %v4336_v17, %v1991_v63 }
 0xdb2   :  { %3814 = vmatpush3.xpose.msk.msra.mxu1 %vm443_vm2, %v4573_v62 }
 0xdb3   :  { %3809 = vmatpush3.xpose.msk.msra.mxu0 %vm443_vm2, %v4576_v0  ;;  %3823 = vmatprep.subr.mxu1 %v4192_v16 }
 0xdb4   :  { %3818 = vmatprep.subr.mxu0 %v4192_v16 }
 0xdb5   :  { %3816 = vmatmul.mubr.msk.f32.vlgmr.msra.gmra.mrb[24].mxu1 %vm443_vm2, %v4364_v28 }
 0xdb6   :  { %3811 = vmatmul.mubr.msk.f32.vlgmr.msra.gmra.mrb[20].mxu0 %vm443_vm2, %v4367_v30  ;;  %3824 = vmatpush3.msra.mxu1 %v4387_v58 }
 0xdb7   :  { %3819 = vmatpush3.msra.mxu0 %v4389_v59  ;;  %3825 = vmatprep.mubr.msk.f32.mxu1 %vm4193_vm1, %v4192_v16 }
 0xdb8   :  { %3833 = vmatprep.subr.mxu1 %v4192_v16  ;;  %3820 = vmatprep.mubr.msk.f32.mxu0 %vm4193_vm1, %v4192_v16 }
 0xdb9   :  { %3828 = vmatprep.subr.mxu0 %v4192_v16 }
 0xe88   :  { %v2148_v17 = vpop.f32.mrb[24].mxu1 }
 0xe89   :  { %v2072_v2 = vpop.f32.mrb[20].mxu0  ;;  %v3817_v5 = vpop.f32.mrb[25].mxu1  ;;  %v2155_v20 = vsel %vm443_vm2, %v2148_v17, -inf }
 0xe8a   :  { %2156 = vmax.xlane.f32.xlu1 %v2155_v20  ;;  %v3812_v3 = vpop.f32.mrb[21].mxu0  ;;  %v2152_v58 = vsel %vm443_vm2, %v2072_v2, -inf }
 0xe8b   :  { %2153 = vmax.xlane.f32.xlu0 %v2152_v58 }
 0xf17   :  { %v2157_v59 = vpop.xlane.xlu1 %2156 }
 0xf18   :  { %v2159_v8 = vsub.f32 %v2148_v17, %v2157_v59  ;;  %v2154_v6 = vpop.xlane.xlu0 %2153 }
 0xf19   :  { %v2158_v7 = vsub.f32 %v2072_v2, %v2154_v6 }
 0xf1a   :  { %v2162_v9 = vmul.f32 1.442695, %v2159_v8 }
 0xf1b   :  { %v2160_v10 = vmul.f32 1.442695, %v2158_v7 }
 0xf1c   :  { %4006 = vpow2.f32 %v2162_v9 }
 0xf1d   :  { %4008 = vpow2.f32 %v2160_v10 }
 0xf26   :  { %v4007_v11 = vpop.eup %4006 }
 0xf27   :  { %v4009_v12 = vpop.eup %4008  ;;  %v2167_v18 = vsel %vm443_vm2, %v4007_v11, 0.0 }
 0xf28   :  { %2168 = vadd.xlane.f32.xlu1 %v2167_v18  ;;  %v2164_v19 = vsel %vm443_vm2, %v4009_v12, 0.0 }
 0xf29   :  { %2165 = vadd.xlane.f32.xlu0 %v2164_v19 }
 0xf39   :  { %2402 = vrot.lane.b32.xlu1 %v4573_v62, %s4194_s25 }
 0xf3d   :  { %2322 = vrot.lane.b32.xlu1 %v4367_v30, %s4194_s25 }
 0xf3f   :  { %2324 = vrot.lane.b32.xlu0 %v4576_v0, %s4194_s25 }
 0xf41   :  { %2400 = vrot.lane.b32.xlu1 %v4364_v28, %s4194_s25 }
 0xfb5   :  { %v2169_v21 = vpop.xlane.xlu1 %2168 }
 0xfb6   :  { %4010 = vrcp.f32 %v2169_v21  ;;  %v2166_v25 = vpop.xlane.xlu0 %2165 }
 0xfb7   :  { %4012 = vrcp.f32 %v2166_v25 }
 0xfb9   :  { %v2403_v22 = vpop.permute.xlu1 %2402 }
 0xfba   :  { %v2325_v34 = vpop.permute.xlu0 %2324 }
 0xfbd   :  { %v2323_v26 = vpop.permute.xlu1 %2322 }
 0xfc0   :  { %v4011_v24 = vpop.eup %4010 }
 0xfc1   :  { %v4013_v29 = vpop.eup %4012  ;;  %v2173_v32 = vmul.f32 %v4011_v24, %v4007_v11  ;;  %v2401_v36 = vpop.permute.xlu1 %2400 }
 0xfc2   :  { %v2172_v33 = vmul.f32 %v4013_v29, %v4009_v12 }
 0xfc3   :  { %3826 = vmatmul.mubr.msk.f32.vlgmr.msra.gmra.mrb[26].mxu1 %vm443_vm2, %v2173_v32 }
 0xfc4   :  { %3834 = vmatpush3.xpose.msk.msra.mxu1 %vm443_vm2, %v2403_v22  ;;  %3821 = vmatmul.mubr.msk.f32.vlgmr.msra.gmra.mrb[22].mxu0 %vm443_vm2, %v2172_v33 }
 0xfc5   :  { %3829 = vmatpush3.xpose.msk.msra.mxu0 %vm443_vm2, %v2325_v34  ;;  %3835 = vmatprep.mubr.msk.f32.mxu1 %vm4193_vm1, %v4192_v16 }
 0xfc6   :  { %3843 = vmatprep.subr.mxu1 %v4192_v16  ;;  %3830 = vmatprep.mubr.msk.f32.mxu0 %vm4193_vm1, %v4192_v16 }
 0xfc7   :  { %3836 = vmatmul.mubr.msk.f32.vlgmr.msra.gmra.mrb[28].mxu1 %vm443_vm2, %v2401_v36  ;;  %3838 = vmatprep.subr.mxu0 %v4192_v16 }
 0xfc8   :  { %3844 = vmatpush3.msra.mxu1 %v4431_v35  ;;  %3831 = vmatmul.mubr.msk.f32.vlgmr.msra.gmra.mrb[24].mxu0 %vm443_vm2, %v2323_v26 }
 0xfc9   :  { %3839 = vmatpush3.msra.mxu0 %v4427_v31  ;;  %3845 = vmatprep.mubr.msk.f32.mxu1 %vm4193_vm1, %v4192_v16 }
 0xfca   :  { %3853 = vmatprep.subr.mxu1 %v4192_v16  ;;  %3840 = vmatprep.mubr.msk.f32.mxu0 %vm4193_vm1, %v4192_v16 }
 0xfcb   :  { %3848 = vmatprep.subr.mxu0 %v4192_v16 }
0x1096   :  { %v2316_v37 = vpop.f32.mrb[26].mxu1 }
0x1097   :  { %2321 = vst.msk [vmem:[#allocation2 + $0x8] sm:$0xff] %vm443_vm2, %v2316_v37  ;;  %v2243_v38 = vpop.f32.mrb[22].mxu0  ;;  %v3827_v39 = vpop.f32.mrb[27].mxu1 }
0x1098   :  { %2320 = vst.msk [vmem:[#allocation2] sm:$0xff] %vm443_vm2, %v2243_v38  ;;  %v3822_v35 = vpop.f32.mrb[23].mxu0 }
0x109a   :  { %v2474_v40 = vpop.f32.mrb[28].mxu1 }
0x109b   :  { %v2396_v31 = vpop.f32.mrb[24].mxu0  ;;  %v3837_v41 = vpop.f32.mrb[29].mxu1  ;;  %v2481_v15 = vsel %vm443_vm2, %v2474_v40, -inf }
0x109c   :  { %2482 = vmax.xlane.f32.xlu1 %v2481_v15  ;;  %v3832_v13 = vpop.f32.mrb[25].mxu0  ;;  %v2478_v42 = vsel %vm443_vm2, %v2396_v31, -inf }
0x109d   :  { %2479 = vmax.xlane.f32.xlu0 %v2478_v42 }
0x10ad   :  { %2736 = vrot.lane.b32.xlu1 %v4573_v62, %s4195_s28 }
0x10b1   :  { %2656 = vrot.lane.b32.xlu1 %v4367_v30, %s4195_s28 }
0x10b5   :  { %2734 = vrot.lane.b32.xlu1 %v4364_v28, %s4195_s28 }
0x1129   :  { %v2483_v43 = vpop.xlane.xlu1 %2482 }
0x112a   :  { %v2485_v44 = vsub.f32 %v2474_v40, %v2483_v43  ;;  %v2480_v45 = vpop.xlane.xlu0 %2479 }
0x112b   :  { %v2484_v47 = vsub.f32 %v2396_v31, %v2480_v45 }
0x112c   :  { %v2488_v48 = vmul.f32 1.442695, %v2485_v44 }
0x112d   :  { %v2486_v49 = vmul.f32 1.442695, %v2484_v47  ;;  %v2737_v57 = vpop.permute.xlu1 %2736 }
0x112e   :  { %4014 = vpow2.f32 %v2488_v48 }
0x112f   :  { %4016 = vpow2.f32 %v2486_v49 }
0x1131   :  { %v2657_v61 = vpop.permute.xlu1 %2656 }
0x1135   :  { %v2735_v5 = vpop.permute.xlu1 %2734 }
0x1138   :  { %v4015_v50 = vpop.eup %4014 }
0x1139   :  { %v2493_v51 = vsel %vm443_vm2, %v4015_v50, 0.0  ;;  %v4017_v52 = vpop.eup %4016 }
0x113a   :  { %2494 = vadd.xlane.f32.xlu0 %v2493_v51  ;;  %v2490_v53 = vsel %vm443_vm2, %v4017_v52, 0.0 }
0x113e   :  { %2491 = vadd.xlane.f32.xlu0 %v2490_v53 }
0x1154   :  { %2658 = vrot.lane.b32.xlu0 %v4576_v0, %s4195_s28 }
0x11c7   :  { %v2495_v54 = vpop.xlane.xlu0 %2494 }
0x11c8   :  { %4018 = vrcp.f32 %v2495_v54 }
0x11cb   :  { %v2492_v55 = vpop.xlane.xlu0 %2491 }
0x11cc   :  { %4020 = vrcp.f32 %v2492_v55 }
0x11cf   :  { %v2659_v20 = vpop.permute.xlu0 %2658 }
0x11d2   :  { %v4019_v60 = vpop.eup %4018 }
0x11d3   :  { %v2499_v63 = vmul.f32 %v4019_v60, %v4015_v50 }
0x11d5   :  { %3846 = vmatmul.mubr.msk.f32.vlgmr.msra.gmra.mrb[30].mxu1 %vm443_vm2, %v2499_v63 }
0x11d6   :  { %v4021_v17 = vpop.eup %4020  ;;  %3854 = vmatpush3.xpose.msk.msra.mxu1 %vm443_vm2, %v2737_v57  ;;  %3855 = vmatprep.mubr.msk.f32.mxu1 %vm4193_vm1, %v4192_v16 }
0x11d7   :  { %v2498_v2 = vmul.f32 %v4021_v17, %v4017_v52  ;;  %3863 = vmatprep.subr.mxu1 %v4192_v16 }
0x11d9   :  { %3841 = vmatmul.mubr.msk.f32.vlgmr.msra.gmra.mrb[26].mxu0 %vm443_vm2, %v2498_v2  ;;  %3856 = vmatmul.mubr.msk.f32.vlgmr.msra.gmra.mrb[32].mxu1 %vm443_vm2, %v2735_v5 }
0x11da   :  { %3849 = vmatpush3.xpose.msk.msra.mxu0 %vm443_vm2, %v2659_v20  ;;  %3864 = vmatpush3.msra.mxu1 %v4475_v23 }
0x11db   :  { %3850 = vmatprep.mubr.msk.f32.mxu0 %vm4193_vm1, %v4192_v16  ;;  %3858 = vmatprep.subr.mxu0 %v4192_v16 }
0x11dc   :  { %3865 = vmatprep.mubr.msk.f32.mxu1 %vm4193_vm1, %v4192_v16  ;;  %3873 = vmatprep.subr.mxu1 %v4192_v16 }
0x11dd   :  { %3851 = vmatmul.mubr.msk.f32.vlgmr.msra.gmra.mrb[28].mxu0 %vm443_vm2, %v2657_v61 }
0x11de   :  { %3859 = vmatpush3.msra.mxu0 %v4471_v1  ;;  %3860 = vmatprep.mubr.msk.f32.mxu0 %vm4193_vm1, %v4192_v16 }
0x11df   :  { %3868 = vmatprep.subr.mxu0 %v4192_v16 }
0x12a8   :  { %v4662_v23 = vpop.f32.mrb[30].mxu1 }
0x12a9   :  { %v3847_v3 = vpop.f32.mrb[31].mxu1 }
0x12ac   :  { %v4664_v58 = vpop.f32.mrb[26].mxu0  ;;  %v2808_v59 = vpop.f32.mrb[32].mxu1 }
0x12ad   :  { %v3842_v8 = vpop.f32.mrb[27].mxu0  ;;  %v3857_v6 = vpop.f32.mrb[33].mxu1  ;;  %v2815_v7 = vsel %vm443_vm2, %v2808_v59, -inf }
0x12ae   :  { %2816 = vmax.xlane.f32.xlu1 %v2815_v7 }
0x12b0   :  { %v2730_v9 = vpop.f32.mrb[28].mxu0 }
0x12b1   :  { %v3852_v10 = vpop.f32.mrb[29].mxu0  ;;  %v2812_v1 = vsel %vm443_vm2, %v2730_v9, -inf }
0x12b2   :  { %2813 = vmax.xlane.f32.xlu0 %v2812_v1  ;;  %v4042_v1 = vld [vmem:[#allocation6 + $0x8] sm:$0xff] }
0x12bf   :  { %3070 = vrot.lane.b32.xlu1 %v4573_v62, %s4196_s29 }
0x12c3   :  { %2990 = vrot.lane.b32.xlu1 %v4367_v30, %s4196_s29 }
0x12c7   :  { %3068 = vrot.lane.b32.xlu1 %v4364_v28, %s4196_s29 }
0x133b   :  { %v2817_v11 = vpop.xlane.xlu1 %2816 }
0x133c   :  { %v2819_v12 = vsub.f32 %v2808_v59, %v2817_v11 }
0x133e   :  { %v2822_v18 = vmul.f32 1.442695, %v2819_v12  ;;  %v4043_v12 = vld [vmem:[#allocation6] sm:$0xff] }
0x133f   :  { %v2814_v19 = vpop.xlane.xlu0 %2813  ;;  %v3071_v29 = vpop.permute.xlu1 %3070 }
0x1340   :  { %4022 = vpow2.f32 %v2822_v18  ;;  %v2818_v21 = vsub.f32 %v2730_v9, %v2814_v19 }
0x1342   :  { %v2820_v25 = vmul.f32 1.442695, %v2818_v21 }
0x1343   :  { %v2991_v33 = vpop.permute.xlu1 %2990 }
0x1344   :  { %4024 = vpow2.f32 %v2820_v25 }
0x134a   :  { %v4023_v22 = vpop.eup %4022 }
0x134b   :  { %v2827_v24 = vsel %vm443_vm2, %v4023_v22, 0.0 }
0x134c   :  { %2828 = vadd.xlane.f32.xlu0 %v2827_v24 }
0x134e   :  { %v4025_v26 = vpop.eup %4024 }
0x134f   :  { %v2824_v62 = vsel %vm443_vm2, %v4025_v26, 0.0 }
0x1350   :  { %2825 = vadd.xlane.f32.xlu0 %v2824_v62 }
0x1366   :  { %2992 = vrot.lane.b32.xlu0 %v4576_v0, %s4196_s29  ;;  %v3069_v0 = vpop.permute.xlu1 %3068 }
0x13d9   :  { %v2829_v28 = vpop.xlane.xlu0 %2828 }
0x13da   :  { %4026 = vrcp.f32 %v2829_v28 }
0x13dd   :  { %v2826_v30 = vpop.xlane.xlu0 %2825 }
0x13de   :  { %4028 = vrcp.f32 %v2826_v30 }
0x13e1   :  { %v2993_v38 = vpop.permute.xlu0 %2992 }
0x13e4   :  { %v4027_v32 = vpop.eup %4026 }
0x13e5   :  { %v2833_v34 = vmul.f32 %v4027_v32, %v4023_v22 }
0x13e7   :  { %3866 = vmatmul.mubr.msk.f32.vlgmr.msra.gmra.mrb[34].mxu1 %vm443_vm2, %v2833_v34 }
0x13e8   :  { %v4029_v36 = vpop.eup %4028  ;;  %3874 = vmatpush3.xpose.msk.msra.mxu1 %vm443_vm2, %v3071_v29  ;;  %3875 = vmatprep.mubr.msk.f32.mxu1 %vm4193_vm1, %v4192_v16 }
0x13e9   :  { %v2832_v37 = vmul.f32 %v4029_v36, %v4025_v26  ;;  %3883 = vmatprep.subr.mxu1 %v4192_v16 }
0x13eb   :  { %3861 = vmatmul.mubr.msk.f32.vlgmr.msra.gmra.mrb[30].mxu0 %vm443_vm2, %v2832_v37  ;;  %3876 = vmatmul.mubr.msk.f32.vlgmr.msra.gmra.mrb[36].mxu1 %vm443_vm2, %v3069_v0 }
0x13ec   :  { %3869 = vmatpush3.xpose.msk.msra.mxu0 %vm443_vm2, %v2993_v38  ;;  %3884 = vmatpush3.msra.mxu1 %v4508_v46 }
0x13ed   :  { %3870 = vmatprep.mubr.msk.f32.mxu0 %vm4193_vm1, %v4192_v16  ;;  %3878 = vmatprep.subr.mxu0 %v4192_v16 }
0x13ee   :  { %3885 = vmatprep.mubr.msk.f32.mxu1 %vm4193_vm1, %v4192_v16 }
0x13ef   :  { %3871 = vmatmul.mubr.msk.f32.vlgmr.msra.gmra.mrb[32].mxu0 %vm443_vm2, %v2991_v33 }
0x13f0   :  { %3879 = vmatpush3.msra.mxu0 %v4520_v56  ;;  %3880 = vmatprep.mubr.msk.f32.mxu0 %vm4193_vm1, %v4192_v16 }
0x13f1   :  { %3948 = vmatprep.subr.bf16.mxu0 %v4530_v4 }
0x14ba   :  { %v2976_v39 = vpop.f32.mrb[34].mxu1 }
0x14bb   :  { %v3867_v35 = vpop.f32.mrb[35].mxu1 }
0x14be   :  { %v2903_v46 = vpop.f32.mrb[30].mxu0  ;;  %v3142_v40 = vpop.f32.mrb[36].mxu1 }
0x14bf   :  { %v3862_v31 = vpop.f32.mrb[31].mxu0  ;;  %v3877_v41 = vpop.f32.mrb[37].mxu1  ;;  %v3149_v15 = vsel %vm443_vm2, %v3142_v40, -inf }
0x14c0   :  { %3150 = vmax.xlane.f32.xlu1 %v3149_v15 }
0x14c2   :  { %v3064_v13 = vpop.f32.mrb[32].mxu0 }
0x14c3   :  { %v3872_v42 = vpop.f32.mrb[33].mxu0  ;;  %v3146_v43 = vsel %vm443_vm2, %v3064_v13, -inf }
0x14c4   :  { %3147 = vmax.xlane.f32.xlu0 %v3146_v43 }
0x14d1   :  { %2650 = vrot.lane.b32.xlu1 %v4662_v23, %s4189_s10 }
0x14d5   :  { %2982 = vrot.lane.b32.xlu1 %v2903_v46, %s4197_s30 }
0x14d9   :  { %2984 = vrot.lane.b32.xlu1 %v2976_v39, %s4197_s30 }
0x154d   :  { %v3151_v16 = vpop.xlane.xlu1 %3150 }
0x154e   :  { %v3153_v56 = vsub.f32 %v3142_v40, %v3151_v16 }
0x1550   :  { %v3156_v48 = vmul.f32 1.442695, %v3153_v56 }
0x1551   :  { %v2651_v44 = vpop.permute.xlu1 %2650  ;;  %v3148_v45 = vpop.xlane.xlu0 %3147 }
0x1552   :  { %2655 = vst.msk [vmem:[#allocation2 + $0x8] sm:$0xff] %vm1106_vm3, %v2651_v44  ;;  %v3152_v47 = vsub.f32 %v3064_v13, %v3148_v45 }
0x1554   :  { %v3154_v49 = vmul.f32 1.442695, %v3152_v47 }
0x1555   :  { %v2983_v50 = vpop.permute.xlu1 %2982 }
0x1556   :  { %4030 = vpow2.f32 %v3154_v49 }
0x1557   :  { %4032 = vpow2.f32 %v3156_v48 }
0x1559   :  { %v2985_v51 = vpop.permute.xlu1 %2984 }
0x155a   :  { %2989 = vst.msk [vmem:[#allocation2 + $0x8] sm:$0xff] %vm1447_vm4, %v2985_v51 }
0x1560   :  { %v4031_v52 = vpop.eup %4030 }
0x1561   :  { %v3158_v53 = vsel %vm443_vm2, %v4031_v52, 0.0  ;;  %v4033_v54 = vpop.eup %4032 }
0x1562   :  { %3159 = vadd.xlane.f32.xlu0 %v3158_v53  ;;  %v3161_v55 = vsel %vm443_vm2, %v4033_v54, 0.0 }
0x1566   :  { %3162 = vadd.xlane.f32.xlu0 %v3161_v55 }
0x157c   :  { %2648 = vrot.lane.b32.xlu0 %v4664_v58, %s4189_s10 }
0x15ef   :  { %v3160_v57 = vpop.xlane.xlu0 %3159 }
0x15f0   :  { %4034 = vrcp.f32 %v3160_v57 }
0x15f3   :  { %v3163_v60 = vpop.xlane.xlu0 %3162 }
0x15f4   :  { %4036 = vrcp.f32 %v3163_v60 }
0x15f7   :  { %v2649_v61 = vpop.permute.xlu0 %2648 }
0x15f8   :  { %2654 = vst.msk [vmem:[#allocation2] sm:$0xff] %vm1106_vm3, %v2649_v61 }
0x15f9   :  { %2988 = vst.msk [vmem:[#allocation2] sm:$0xff] %vm1447_vm4, %v2983_v50 }
0x15fa   :  { %v4035_v63 = vpop.eup %4034 }
0x15fb   :  { %v3166_v17 = vmul.f32 %v4035_v63, %v4031_v52 }
0x15fd   :  { %3881 = vmatmul.mubr.msk.f32.vlgmr.msra.gmra.mrb[34].mxu0 %vm443_vm2, %v3166_v17 }
0x15fe   :  { %v4037_v2 = vpop.eup %4036  ;;  %3950 = vmatpush3.bf16.msra.mxu0 %v4530_v4 }
0x15ff   :  { %v3167_v5 = vmul.f32 %v4037_v2, %v4033_v54  ;;  %3952 = vmatprep.subr.bf16.mxu0 %v4533_v27 }
0x1601   :  { %3886 = vmatmul.mubr.msk.f32.vlgmr.msra.gmra.mrb[38].mxu1 %vm443_vm2, %v3167_v5 }
0x1602   :  { %3954 = vmatpush3.bf16.msra.mxu0 %v4533_v27 }
0x16d0   :  { %v3237_v20 = vpop.f32.mrb[34].mxu0 }
0x16d1   :  { %3316 = vrot.lane.b32.xlu0 %v3237_v20, %s4198_s7  ;;  %v3882_v23 = vpop.f32.mrb[35].mxu0 }
0x16d4   :  { %v3310_v3 = vpop.f32.mrb[38].mxu1 }
0x16d5   :  { %3318 = vrot.lane.b32.xlu1 %v3310_v3, %s4198_s7  ;;  %v3887_v58 = vpop.f32.mrb[39].mxu1 }
0x1743   :  { %v3317_v59 = vpop.permute.xlu0 %3316 }
0x1744   :  { %3322 = vst.msk [vmem:[#allocation2] sm:$0xff] %vm1788_vm5, %v3317_v59 }
0x1747   :  { %v3319_v8 = vpop.permute.xlu1 %3318 }
0x1748   :  { %3323 = vst.msk [vmem:[#allocation2 + $0x8] sm:$0xff] %vm1788_vm5, %v3319_v8 }
0x174b   :  { %v3324_v4 = vld [vmem:[#allocation2] sm:$0xff] }
0x174c   :  { %3896 = vmatprep.mubr.msk.f32.mxu0 %vm116_vm0, %v3324_v4 }
0x174f   :  { %v3325_v6 = vld [vmem:[#allocation2 + $0x8] sm:$0xff] }
0x1750   :  { %3897 = vmatmul.mubr.msk.f32.vlgmr.msra.gmra.mrb[36].mxu0 %vm116_vm0, %v3325_v6 }
0x1823   :  { %v3898_v27 = vpop.f32.mrb[36].mxu0 }
0x1824   :  { %v3404_v7 = vadd.f32 %v3898_v27, %v4550_v14  ;;  %v3398_v9 = vpop.f32.mrb[37].mxu0 }
0x1825   :  { %v3399_v10 = vadd.f32 %v4550_v14, %v3398_v9 }
0x1826   :  { %v3408_v11 = vadd.f32 %v4042_v1, %v3404_v7 }
0x1827   :  { %v3407_v18 = vadd.f32 %v4043_v12, %v3399_v10 }
0x1828   :  { %v3412_v19 = vsel %vm116_vm0, %v3408_v11, 0.0 }
0x1829   :  { %3413 = vadd.xlane.f32.xlu1 %v3412_v19  ;;  %v3409_v21 = vsel %vm116_vm0, %v3407_v18, 0.0 }
0x182a   :  { %3410 = vadd.xlane.f32.xlu0 %v3409_v21 }
0x18b6   :  { %v3414_v25 = vpop.xlane.xlu1 %3413 }
0x18b7   :  { %v3416_v22 = vmul.f32 0.03125, %v3414_v25  ;;  %v3411_v24 = vpop.xlane.xlu0 %3410 }
0x18b8   :  { %v3415_v26 = vmul.f32 0.03125, %v3411_v24 }
0x18b9   :  { %v3418_v62 = vsub.f32 %v3408_v11, %v3416_v22 }
0x18ba   :  { %v3417_v28 = vsub.f32 %v3407_v18, %v3415_v26 }
0x18bb   :  { %v3420_v14 = vmul.f32 %v3418_v62, %v3418_v62 }
0x18bc   :  { %v3419_v30 = vmul.f32 %v3417_v28, %v3417_v28 }
0x18bd   :  { %v3424_v32 = vsel %vm116_vm0, %v3420_v14, 0.0 }
0x18be   :  { %v3421_v29 = vsel %vm116_vm0, %v3419_v30, 0.0 }
0x18bf   :  { %3422 = vadd.xlane.f32.xlu0 %v3421_v29 }
0x18c3   :  { %3425 = vadd.xlane.f32.xlu0 %v3424_v32 }
0x18c4   :  { %4143 = shalt.err (!%p4140_p8)
}
0x18c5   :  { %s4144_s19 = scalar_lea.hbm %s4771_s5, 256 }
0x18c6   :  { %p4145_p9 = scmp.ne.s32.totalorder %s4771_s5, %s4144_s19  ;;  %p4148_p10 = scmp.lt.u32.totalorder %s4144_s19, %s4771_s5 }
0x18c8   :  { %p4150_p11 = pnand %p4148_p10, %p4145_p9 }
0x18ca   :  { %4153 = shalt.err (!%p4150_p11)
}
0x18cb   :  { %3462 = dma.vmem_to_hbm [thread:$0]  %s3457_s15, 256, %s4771_s5, [#allocation5], %s4188_s9, %s4188_s9, %s4189_s10  }
0x18cc   :  { %v3554_v35 = vld [vmem:[%s4770_s4 + $0x6] ss:$0 sm:$0xff]  ;;  %v3555_v40 = vld [vmem:[%s4770_s4 + $0x7] ss:$0 sm:$0xff]  ;;  %s4200_s5 = smov [#allocation12]  }
0x18cd   :  { %s3468_s28 = sshll.u32 %s4200_s5, 4  ;;  %s3469_s28 = int_to_ptr.vmem [resolvable:$true] %s3468_s28 }
0x18ce   :  { %s4154_s29 = scalar_lea.vmem %s3469_s28, 256  ;;  %p4159_p13 = scmp.lt.s32.totalorder %s3469_s28, %s3469_s28 }
0x18cf   :  { %p4155_p12 = scmp.ne.s32.totalorder %s3469_s28, %s4154_s29  ;;  %p4160_p0 = scmp.lt.s32.totalorder %s4154_s29, %s4154_s29 }
0x18d1   :  { %p4161_p1 = por %p4160_p0, %p4159_p13 }
0x18d3   :  { %p4162_p2 = pnand %p4161_p1, %p4155_p12 }
0x194c   :  { %v3423_v33 = vpop.xlane.xlu0 %3422 }
0x194d   :  { %v3427_v34 = vmul.f32 0.03125, %v3423_v33 }
0x194f   :  { %v3429_v36 = vadd.f32 1e-05, %v3427_v34 }
0x1950   :  { %v3426_v37 = vpop.xlane.xlu0 %3425 }
0x1951   :  { %4038 = vrsqrt.f32 %v3429_v36  ;;  %v3428_v0 = vmul.f32 0.03125, %v3426_v37 }
0x1953   :  { %v3430_v38 = vadd.f32 1e-05, %v3428_v0 }
0x1955   :  { %4040 = vrsqrt.f32 %v3430_v38 }
0x195b   :  { %v4039_v39 = vpop.eup %4038 }
0x195c   :  { %v3433_v46 = vmul.f32 %v4039_v39, %v3417_v28 }
0x195e   :  { %v3439_v31 = vmul.f32 %v3554_v35, %v3433_v46 }
0x195f   :  { %v4041_v41 = vpop.eup %4040 }
0x1960   :  { %v3434_v15 = vmul.f32 %v4041_v41, %v3418_v62  ;;  %v3445_v13 = vadd.f32 %v3555_v40, %v3439_v31 }
0x1962   :  { %v3440_v42 = vmul.f32 %v3554_v35, %v3434_v15  ;;  %3449 = vst.msk [vmem:[#allocation12] sm:$0xff] %vm116_vm0, %v3445_v13 }
0x1964   :  { %v3446_v43 = vadd.f32 %v3555_v40, %v3440_v42 }
0x1966   :  { %3450 = vst.msk [vmem:[#allocation12 + $0x8] sm:$0xff] %vm116_vm0, %v3446_v43 }
0x1967   :  { %4165 = shalt.err (!%p4162_p2)
}
0x1968   :  { %s4166_s7 = scalar_lea.hbm %s4772_s6, 256 }
0x1969   :  { %p4167_p3 = scmp.ne.s32.totalorder %s4772_s6, %s4166_s7  ;;  %p4170_p4 = scmp.lt.u32.totalorder %s4166_s7, %s4772_s6 }
0x196b   :  { %p4172_p5 = pnand %p4170_p4, %p4167_p3 }
0x196d   :  { %4175 = shalt.err (!%p4172_p5)
}
0x196e   :  { %3474 = dma.vmem_to_hbm [thread:$0]  %s3469_s28, 256, %s4772_s6, [#allocation13], %s4188_s9, %s4188_s9, %s4189_s10  }
0x196f   :  { %4182 = dma.done.wait [#allocation5], 256  }
0x1970   :  { %4183 = vsyncadd [#allocation5], 4294967040 }
0x1971   :  { %4184 = dma.done.wait [#allocation13], 256  }
0x1972   :  { %4185 = vsyncadd [#allocation13], 4294967040 }
0x1973   :  { %3481 = vsyncpa [#allocation4], 1 }
0x1974   :  { %3482 = vsyncpa [#allocation7], 1 }
0x1975   :  { %3483 = vsyncpa [#allocation10], 1 }
0x1976   :  { %3484 = vsyncpa [#allocation5], 1 }
0x1977   :  { %3485 = vsyncpa [#allocation13], 1 }

</bundles_post_ra>
